<compile_context>
chip_gen: v7x
topology: tpu7x:2x2x1
jax: 0.10.0
libtpu: 0.0.40
codegen_flags: <defaults>
</compile_context>

<pallas_src>
import functools

import jax
import jax.numpy as jnp
from jax.experimental import pallas as pl
from jax.experimental.pallas import tpu as pltpu

LANE = 128          # lane width / padded channel dim / node-edge alignment
SUBLANE = 8         # sublane alignment for the graph-batch dim
BN_EPS = 1e-5       # torch.nn.BatchNorm1d default


def _round_up(x, m):
    return ((x + m - 1) // m) * m


# ----------------------------------------------------------------------------
# Fused kernel: num_layers x (GINEConv + relu)  ->  mean pool  ->  head MLP
#               -> softmax.   Single grid point; everything resident in VMEM.
# ----------------------------------------------------------------------------
def fused_gine_kernel(
        # dense tensors (VMEM)
        gather_ref,   # (E_pad, N_pad) bf16 one-hot: row e selects node src[e]
        scatter_ref,  # (N_pad, E_pad) bf16 one-hot: row d sums edges with dst==d
        x_ref,        # (N_pad, CP) f32 node features
        ea_ref,       # (E_pad, CP) f32 edge attributes
        pool_ref,     # (B_pad, N_pad) f32 normalized mean-pool matrix
        we_ref,       # (L, CP, CP) bf16 edge-attr Linear weights
        w1_ref,       # (L, CP, CP) bf16 conv MLP first Linear
        w2_ref,       # (L, CP, CP) bf16 conv MLP second Linear
        convb_ref,    # (L, 8, CP) f32 rows: be, b1, bn_scale, bn_shift, b2
        hw_ref,       # (2, CP, CP) bf16 head MLP weights
        hb_ref,       # (8, CP) f32 rows 0,1: head biases
        # outputs (VMEM)
        probs_ref, emb_ref,
        *, out_channels):
    num_layers = we_ref.shape[0]

    gather = gather_ref[...]                    # bf16, exact 0/1 values
    scatter = scatter_ref[...]                  # bf16, exact 0/1 values
    ea_bf16 = ea_ref[...].astype(jnp.bfloat16)

    h = x_ref[...]                              # (N_pad, CP) f32

    for l in range(num_layers):                 # static unroll; weights resident
        cb = convb_ref[l]                       # (8, CP) f32

        # edge-attribute projection: Linear(edge_dim, C_in)      (MXU bf16->f32)
        eproj = jnp.dot(ea_bf16, we_ref[l],
                        preferred_element_type=jnp.float32) + cb[0:1, :]

        # gather x[src] for every edge:  G @ h                   (MXU)
        x_src = jnp.dot(gather, h.astype(jnp.bfloat16),
                        preferred_element_type=jnp.float32)
        msg = jnp.maximum(x_src + eproj, 0.0)   # relu(x_j + e_proj)  (VPU f32)

        # scatter-add over dst (duplicate-dst safe):  S^T @ msg   (MXU)
        aggr = jnp.dot(scatter, msg.astype(jnp.bfloat16),
                       preferred_element_type=jnp.float32)

        # GINE update: (1 + eps) * x + aggr, eps = 0 (train_eps=False)
        hu = h + aggr

        # nn = MLP([C_in, H, H]): Linear -> BN(eval, folded) -> ReLU -> Linear
        h1 = jnp.dot(hu.astype(jnp.bfloat16), w1_ref[l],
                     preferred_element_type=jnp.float32) + cb[1:2, :]
        h1 = jnp.maximum(h1 * cb[2:3, :] + cb[3:4, :], 0.0)
        h2 = jnp.dot(h1.astype(jnp.bfloat16), w2_ref[l],
                     preferred_element_type=jnp.float32) + cb[4:5, :]

        # outer .relu() in the classifier forward
        h = jnp.maximum(h2, 0.0)

    # global mean pool (normalized pool matrix precomputed on host, f32)
    g = jnp.dot(pool_ref[...], h, preferred_element_type=jnp.float32)
    emb_ref[...] = g

    # head: MLP([H, H, out], norm=None, dropout=0.5 -> identity at inference)
    hb = hb_ref[...]
    hh = jnp.maximum(
        jnp.dot(g.astype(jnp.bfloat16), hw_ref[0],
                preferred_element_type=jnp.float32) + hb[0:1, :], 0.0)
    logits = jnp.dot(hh.astype(jnp.bfloat16), hw_ref[1],
                     preferred_element_type=jnp.float32) + hb[1:2, :]

    # softmax over the real class columns only (mask padded lanes)
    col = jax.lax.broadcasted_iota(jnp.int32, logits.shape, 1)
    logits = jnp.where(col < out_channels, logits, -1e30)
    m = jnp.max(logits, axis=1, keepdims=True)
    ex = jnp.exp(logits - m)
    denom = jnp.sum(ex, axis=1, keepdims=True)
    probs_ref[...] = ex / denom


# ----------------------------------------------------------------------------
# Wrapper: padding, one-hot / pool construction (graph structure only),
#          cost estimate, pallas_call.
# ----------------------------------------------------------------------------
def modified_gine_forward(x, edge_index, batch, edge_attr, packed, num_graphs,
                          hidden_channels, out_channels, cp=LANE):
    n, cin = x.shape
    e, edge_dim = edge_attr.shape
    num_layers = packed["we"].shape[0]

    n_pad = _round_up(n, LANE)       # 128-aligned -> lane-dense MXU K dims
    e_pad = _round_up(e, LANE)
    b_pad = _round_up(num_graphs, SUBLANE)

    x_pad = jnp.zeros((n_pad, cp), jnp.float32).at[:n, :cin].set(x)
    ea_pad = jnp.zeros((e_pad, cp), jnp.float32).at[:e, :edge_dim].set(edge_attr)

    src = edge_index[0].astype(jnp.int32)
    dst = edge_index[1].astype(jnp.int32)

    # one-hot gather / scatter matrices (exact 0/1, bf16-safe)
    gather = (jnp.zeros((e_pad, n_pad), jnp.float32)
              .at[jnp.arange(e), src].set(1.0).astype(jnp.bfloat16))
    scatter = (jnp.zeros((n_pad, e_pad), jnp.float32)
               .at[dst, jnp.arange(e)].set(1.0).astype(jnp.bfloat16))

    # normalized mean-pool matrix (B_pad, N_pad), f32
    onehot = jax.nn.one_hot(batch, num_graphs, dtype=jnp.float32)      # (N, B)
    counts = jnp.maximum(onehot.sum(axis=0), 1.0)                      # (B,)
    pool = (onehot / counts).T                                         # (B, N)
    pool_pad = jnp.zeros((b_pad, n_pad), jnp.float32).at[:num_graphs, :n].set(pool)

    vmem = pl.BlockSpec(memory_space=pltpu.MemorySpace.VMEM)

    operands = (gather, scatter, x_pad, ea_pad, pool_pad,
                packed["we"], packed["w1"], packed["w2"], packed["convb"],
                packed["hw"], packed["hb"])

    flops = (2 * num_layers * (e_pad * cp * cp          # edge projection
                               + e_pad * n_pad * cp     # gather matmul
                               + n_pad * e_pad * cp     # scatter matmul
                               + 2 * n_pad * cp * cp)   # conv MLP
             + 2 * (b_pad * n_pad * cp                  # mean pool
                    + 2 * b_pad * cp * cp))             # head MLP
    bytes_accessed = int(sum(a.size * a.dtype.itemsize for a in operands)
                         + 2 * b_pad * cp * 4)
    transcendentals = b_pad * cp                        # softmax exp

    kernel = functools.partial(fused_gine_kernel, out_channels=out_channels)

    probs_pad, emb_pad = pl.pallas_call(
        kernel,
        out_shape=(jax.ShapeDtypeStruct((b_pad, cp), jnp.float32),   # probs
                   jax.ShapeDtypeStruct((b_pad, cp), jnp.float32)),  # embeddings
        in_specs=[vmem] * len(operands),
        out_specs=(vmem, vmem),
        compiler_params=pltpu.CompilerParams(vmem_limit_bytes=64 * 1024 * 1024),
        cost_estimate=pl.CostEstimate(flops=int(flops),
                                      transcendentals=int(transcendentals),
                                      bytes_accessed=bytes_accessed),
    )(*operands)

    probs = probs_pad[:num_graphs, :out_channels]
    graph_embeddings = emb_pad[:num_graphs, :hidden_channels]
    return probs, graph_embeddings


# ----------------------------------------------------------------------------
# Parameters: logical (unpadded, f32) init + packing into lane-padded / bf16 /
# stacked device arrays for the kernel.
# ----------------------------------------------------------------------------
def init_params(key, in_channels, hidden, out_channels, num_layers, edge_dim):
    params = {"convs": []}
    cin = in_channels
    for _ in range(num_layers):
        key, k1, k2, k3 = jax.random.split(key, 4)
        params["convs"].append({
            # GINEConv edge lin: Linear(edge_dim, cin)
            "we": 0.1 * jax.random.normal(k1, (edge_dim, cin), jnp.float32),
            "be": jnp.zeros((cin,), jnp.float32),
            # BatchNorm1d(hidden), eval-mode (running stats + affine)
            "gamma": jnp.ones((hidden,), jnp.float32),
            "beta": jnp.zeros((hidden,), jnp.float32),
            "mean": jnp.zeros((hidden,), jnp.float32),
            "var": jnp.ones((hidden,), jnp.float32),
            # nn = MLP([cin, hidden, hidden])
            "w1": 0.1 * jax.random.normal(k2, (cin, hidden), jnp.float32),
            "b1": jnp.zeros((hidden,), jnp.float32),
            "w2": 0.1 * jax.random.normal(k3, (hidden, hidden), jnp.float32),
            "b2": jnp.zeros((hidden,), jnp.float32),
        })
        cin = hidden
    key, k1, k2 = jax.random.split(key, 3)
    # final MLP([hidden, hidden, out_channels], norm=None, dropout=0.5)
    params["head"] = {
        "w1": 0.1 * jax.random.normal(k1, (hidden, hidden), jnp.float32),
        "b1": jnp.zeros((hidden,), jnp.float32),
        "w2": 0.1 * jax.random.normal(k2, (hidden, out_channels), jnp.float32),
        "b2": jnp.zeros((out_channels,), jnp.float32),
    }
    return params


def _pad2(a, rows, cols):
    return jnp.zeros((rows, cols), a.dtype).at[:a.shape[0], :a.shape[1]].set(a)


def pack_params(params, cp=LANE):
    we, w1, w2, convb = [], [], [], []
    for p in params["convs"]:
        we.append(_pad2(p["we"], cp, cp))
        w1.append(_pad2(p["w1"], cp, cp))
        w2.append(_pad2(p["w2"], cp, cp))
        scale = p["gamma"] / jnp.sqrt(p["var"] + BN_EPS)
        shift = p["beta"] - p["mean"] * scale
        cb = jnp.zeros((8, cp), jnp.float32)
        cb = cb.at[0, :p["be"].shape[0]].set(p["be"])
        cb = cb.at[1, :p["b1"].shape[0]].set(p["b1"])
        cb = cb.at[2, :scale.shape[0]].set(scale)
        cb = cb.at[3, :shift.shape[0]].set(shift)
        cb = cb.at[4, :p["b2"].shape[0]].set(p["b2"])
        convb.append(cb)
    hp = params["head"]
    hw = jnp.stack([_pad2(hp["w1"], cp, cp), _pad2(hp["w2"], cp, cp)])
    hb = jnp.zeros((8, cp), jnp.float32)
    hb = hb.at[0, :hp["b1"].shape[0]].set(hp["b1"])
    hb = hb.at[1, :hp["b2"].shape[0]].set(hp["b2"])
    return {
        "we": jnp.stack(we).astype(jnp.bfloat16),
        "w1": jnp.stack(w1).astype(jnp.bfloat16),
        "w2": jnp.stack(w2).astype(jnp.bfloat16),
        "convb": jnp.stack(convb),                 # f32
        "hw": hw.astype(jnp.bfloat16),
        "hb": hb,                                  # f32
    }


# ----------------------------------------------------------------------------
# Pure-JAX reference (f32) for correctness checking
# ----------------------------------------------------------------------------
def reference_forward(x, edge_index, batch, edge_attr, params, num_graphs):
    src, dst = edge_index[0], edge_index[1]
    h = x
    for p in params["convs"]:
        eproj = edge_attr @ p["we"] + p["be"]
        msg = jax.nn.relu(h[src] + eproj)
        aggr = jnp.zeros_like(h).at[dst].add(msg)
        hh = h + aggr
        scale = p["gamma"] / jnp.sqrt(p["var"] + BN_EPS)
        shift = p["beta"] - p["mean"] * scale
        h1 = jax.nn.relu((hh @ p["w1"] + p["b1"]) * scale + shift)
        h = jax.nn.relu(h1 @ p["w2"] + p["b2"])
    onehot = jax.nn.one_hot(batch, num_graphs, dtype=jnp.float32)
    counts = jnp.maximum(onehot.sum(axis=0), 1.0)
    g = (onehot.T @ h) / counts[:, None]
    hp = params["head"]
    hh = jax.nn.relu(g @ hp["w1"] + hp["b1"])
    logits = hh @ hp["w2"] + hp["b2"]
    return jax.nn.softmax(logits, axis=1), g


if __name__ == "__main__":
    # Small synthetic graph batch: 2 graphs, 8 nodes each.
    NUM_NODES = 16
    NUM_EDGES = 32
    IN_CHANNELS = 8
    HIDDEN = 32
    OUT_CHANNELS = 2
    NUM_LAYERS = 2
    EDGE_DIM = 4
    NUM_GRAPHS = 2

    key = jax.random.PRNGKey(0)
    kx, ks, kd, ke, kp = jax.random.split(key, 5)

    x = jax.random.normal(kx, (NUM_NODES, IN_CHANNELS), jnp.float32)
    # edges kept within each 8-node graph
    src0 = jax.random.randint(ks, (NUM_EDGES // 2,), 0, 8)
    dst0 = jax.random.randint(kd, (NUM_EDGES // 2,), 0, 8)
    src = jnp.concatenate([src0, src0 + 8])
    dst = jnp.concatenate([dst0, dst0 + 8])
    edge_index = jnp.stack([src, dst]).astype(jnp.int32)           # (2, E)
    edge_attr = jax.random.normal(ke, (NUM_EDGES, EDGE_DIM), jnp.float32)
    batch = jnp.concatenate([jnp.zeros((8,), jnp.int32),
                             jnp.ones((8,), jnp.int32)])

    params = init_params(kp, IN_CHANNELS, HIDDEN, OUT_CHANNELS,
                         NUM_LAYERS, EDGE_DIM)
    CP = _round_up(max(IN_CHANNELS, HIDDEN, EDGE_DIM, OUT_CHANNELS), LANE)
    packed = pack_params(params, cp=CP)

    probs, graph_embeddings = modified_gine_forward(
        x, edge_index, batch, edge_attr, packed, NUM_GRAPHS,
        HIDDEN, OUT_CHANNELS, cp=CP)
    jax.block_until_ready((probs, graph_embeddings))

    ref_probs, ref_emb = reference_forward(
        x, edge_index, batch, edge_attr, params, NUM_GRAPHS)

    assert probs.shape == (NUM_GRAPHS, OUT_CHANNELS)
    assert graph_embeddings.shape == (NUM_GRAPHS, HIDDEN)
    assert bool(jnp.allclose(probs.sum(axis=1), 1.0, atol=5e-3))
    # tolerance covers bf16 MXU operands
    assert bool(jnp.allclose(probs, ref_probs, atol=5e-2, rtol=5e-2))
    assert bool(jnp.allclose(graph_embeddings, ref_emb, atol=5e-2, rtol=5e-2))
    print("KERNEL_OK")
</pallas_src>

<mosaic_0001>
module attributes {stable_mosaic.version = 11 : i64} {
  func.func @fused_gine_kernel(%arg0: memref<128x128xbf16, #tpu.memory_space<vmem>>, %arg1: memref<128x128xbf16, #tpu.memory_space<vmem>>, %arg2: memref<128x128xf32, #tpu.memory_space<vmem>>, %arg3: memref<128x128xf32, #tpu.memory_space<vmem>>, %arg4: memref<8x128xf32, #tpu.memory_space<vmem>>, %arg5: memref<2x128x128xbf16, #tpu.memory_space<vmem>>, %arg6: memref<2x128x128xbf16, #tpu.memory_space<vmem>>, %arg7: memref<2x128x128xbf16, #tpu.memory_space<vmem>>, %arg8: memref<2x8x128xf32, #tpu.memory_space<vmem>>, %arg9: memref<2x128x128xbf16, #tpu.memory_space<vmem>>, %arg10: memref<8x128xf32, #tpu.memory_space<vmem>>, %arg11: memref<8x128xf32, #tpu.memory_space<vmem>>, %arg12: memref<8x128xf32, #tpu.memory_space<vmem>>) attributes {dimension_semantics = [], scalar_prefetch = 0 : i64, scratch_operands = 0 : i64, tpu.core_type = #tpu.core_type<tc>} {
    %c0 = arith.constant 0 : index
    %c0_0 = arith.constant 0 : index
    %0 = vector.load %arg0[%c0, %c0_0] : memref<128x128xbf16, #tpu.memory_space<vmem>>, vector<128x128xbf16>
    %c0_1 = arith.constant 0 : index
    %c0_2 = arith.constant 0 : index
    %1 = vector.load %arg1[%c0_1, %c0_2] : memref<128x128xbf16, #tpu.memory_space<vmem>>, vector<128x128xbf16>
    %c0_3 = arith.constant 0 : index
    %c0_4 = arith.constant 0 : index
    %2 = vector.load %arg3[%c0_3, %c0_4] : memref<128x128xf32, #tpu.memory_space<vmem>>, vector<128x128xf32>
    %3 = arith.truncf %2 : vector<128x128xf32> to vector<128x128xbf16>
    %c0_5 = arith.constant 0 : index
    %c0_6 = arith.constant 0 : index
    %4 = vector.load %arg2[%c0_5, %c0_6] : memref<128x128xf32, #tpu.memory_space<vmem>>, vector<128x128xf32>
    %c0_7 = arith.constant 0 : index
    %c0_8 = arith.constant 0 : index
    %c0_9 = arith.constant 0 : index
    %5 = vector.load %arg8[%c0_7, %c0_8, %c0_9] : memref<2x8x128xf32, #tpu.memory_space<vmem>>, vector<1x8x128xf32>
    %6 = vector.shape_cast %5 : vector<1x8x128xf32> to vector<8x128xf32>
    %c0_10 = arith.constant 0 : index
    %c0_11 = arith.constant 0 : index
    %c0_12 = arith.constant 0 : index
    %7 = vector.load %arg5[%c0_10, %c0_11, %c0_12] : memref<2x128x128xbf16, #tpu.memory_space<vmem>>, vector<1x128x128xbf16>
    %8 = vector.shape_cast %7 : vector<1x128x128xbf16> to vector<128x128xbf16>
    %cst = arith.constant dense<0.000000e+00> : vector<128x128xf32>
    %9 = tpu.matmul %3, %8, %cst {dimension_numbers = #tpu.dot_dimension_numbers<[1], [0], [0], [1], [0, 0, 1, 1], [], []>} : vector<128x128xbf16>, vector<128x128xbf16>, vector<128x128xf32> -> vector<128x128xf32>
    %10 = vector.extract_strided_slice %6 {offsets = [0, 0], sizes = [1, 128], strides = [1, 1]} : vector<8x128xf32> to vector<1x128xf32>
    %11 = vector.broadcast %10 : vector<1x128xf32> to vector<128x128xf32>
    %12 = arith.addf %9, %11 : vector<128x128xf32>
    %13 = arith.truncf %4 : vector<128x128xf32> to vector<128x128xbf16>
    %cst_13 = arith.constant dense<0.000000e+00> : vector<128x128xf32>
    %14 = tpu.matmul %0, %13, %cst_13 {dimension_numbers = #tpu.dot_dimension_numbers<[1], [0], [0], [1], [0, 0, 1, 1], [], []>} : vector<128x128xbf16>, vector<128x128xbf16>, vector<128x128xf32> -> vector<128x128xf32>
    %15 = arith.addf %14, %12 : vector<128x128xf32>
    %cst_14 = arith.constant 0.000000e+00 : f32
    %16 = vector.broadcast %cst_14 : f32 to vector<128x128xf32>
    %17 = arith.maximumf %15, %16 : vector<128x128xf32>
    %18 = arith.truncf %17 : vector<128x128xf32> to vector<128x128xbf16>
    %cst_15 = arith.constant dense<0.000000e+00> : vector<128x128xf32>
    %19 = tpu.matmul %1, %18, %cst_15 {dimension_numbers = #tpu.dot_dimension_numbers<[1], [0], [0], [1], [0, 0, 1, 1], [], []>} : vector<128x128xbf16>, vector<128x128xbf16>, vector<128x128xf32> -> vector<128x128xf32>
    %20 = arith.addf %4, %19 : vector<128x128xf32>
    %21 = arith.truncf %20 : vector<128x128xf32> to vector<128x128xbf16>
    %c0_16 = arith.constant 0 : index
    %c0_17 = arith.constant 0 : index
    %c0_18 = arith.constant 0 : index
    %22 = vector.load %arg6[%c0_16, %c0_17, %c0_18] : memref<2x128x128xbf16, #tpu.memory_space<vmem>>, vector<1x128x128xbf16>
    %23 = vector.shape_cast %22 : vector<1x128x128xbf16> to vector<128x128xbf16>
    %cst_19 = arith.constant dense<0.000000e+00> : vector<128x128xf32>
    %24 = tpu.matmul %21, %23, %cst_19 {dimension_numbers = #tpu.dot_dimension_numbers<[1], [0], [0], [1], [0, 0, 1, 1], [], []>} : vector<128x128xbf16>, vector<128x128xbf16>, vector<128x128xf32> -> vector<128x128xf32>
    %25 = vector.extract_strided_slice %6 {offsets = [1, 0], sizes = [1, 128], strides = [1, 1]} : vector<8x128xf32> to vector<1x128xf32>
    %26 = vector.broadcast %25 : vector<1x128xf32> to vector<128x128xf32>
    %27 = arith.addf %24, %26 : vector<128x128xf32>
    %28 = vector.extract_strided_slice %6 {offsets = [2, 0], sizes = [1, 128], strides = [1, 1]} : vector<8x128xf32> to vector<1x128xf32>
    %29 = vector.broadcast %28 : vector<1x128xf32> to vector<128x128xf32>
    %30 = arith.mulf %27, %29 : vector<128x128xf32>
    %31 = vector.extract_strided_slice %6 {offsets = [3, 0], sizes = [1, 128], strides = [1, 1]} : vector<8x128xf32> to vector<1x128xf32>
    %32 = vector.broadcast %31 : vector<1x128xf32> to vector<128x128xf32>
    %33 = arith.addf %30, %32 : vector<128x128xf32>
    %cst_20 = arith.constant 0.000000e+00 : f32
    %34 = vector.broadcast %cst_20 : f32 to vector<128x128xf32>
    %35 = arith.maximumf %33, %34 : vector<128x128xf32>
    %36 = arith.truncf %35 : vector<128x128xf32> to vector<128x128xbf16>
    %c0_21 = arith.constant 0 : index
    %c0_22 = arith.constant 0 : index
    %c0_23 = arith.constant 0 : index
    %37 = vector.load %arg7[%c0_21, %c0_22, %c0_23] : memref<2x128x128xbf16, #tpu.memory_space<vmem>>, vector<1x128x128xbf16>
    %38 = vector.shape_cast %37 : vector<1x128x128xbf16> to vector<128x128xbf16>
    %cst_24 = arith.constant dense<0.000000e+00> : vector<128x128xf32>
    %39 = tpu.matmul %36, %38, %cst_24 {dimension_numbers = #tpu.dot_dimension_numbers<[1], [0], [0], [1], [0, 0, 1, 1], [], []>} : vector<128x128xbf16>, vector<128x128xbf16>, vector<128x128xf32> -> vector<128x128xf32>
    %40 = vector.extract_strided_slice %6 {offsets = [4, 0], sizes = [1, 128], strides = [1, 1]} : vector<8x128xf32> to vector<1x128xf32>
    %41 = vector.broadcast %40 : vector<1x128xf32> to vector<128x128xf32>
    %42 = arith.addf %39, %41 : vector<128x128xf32>
    %cst_25 = arith.constant 0.000000e+00 : f32
    %43 = vector.broadcast %cst_25 : f32 to vector<128x128xf32>
    %44 = arith.maximumf %42, %43 : vector<128x128xf32>
    %c1 = arith.constant 1 : index
    %c0_26 = arith.constant 0 : index
    %c0_27 = arith.constant 0 : index
    %45 = vector.load %arg8[%c1, %c0_26, %c0_27] : memref<2x8x128xf32, #tpu.memory_space<vmem>>, vector<1x8x128xf32>
    %46 = vector.shape_cast %45 : vector<1x8x128xf32> to vector<8x128xf32>
    %c1_28 = arith.constant 1 : index
    %c0_29 = arith.constant 0 : index
    %c0_30 = arith.constant 0 : index
    %47 = vector.load %arg5[%c1_28, %c0_29, %c0_30] : memref<2x128x128xbf16, #tpu.memory_space<vmem>>, vector<1x128x128xbf16>
    %48 = vector.shape_cast %47 : vector<1x128x128xbf16> to vector<128x128xbf16>
    %cst_31 = arith.constant dense<0.000000e+00> : vector<128x128xf32>
    %49 = tpu.matmul %3, %48, %cst_31 {dimension_numbers = #tpu.dot_dimension_numbers<[1], [0], [0], [1], [0, 0, 1, 1], [], []>} : vector<128x128xbf16>, vector<128x128xbf16>, vector<128x128xf32> -> vector<128x128xf32>
    %50 = vector.extract_strided_slice %46 {offsets = [0, 0], sizes = [1, 128], strides = [1, 1]} : vector<8x128xf32> to vector<1x128xf32>
    %51 = vector.broadcast %50 : vector<1x128xf32> to vector<128x128xf32>
    %52 = arith.addf %49, %51 : vector<128x128xf32>
    %53 = arith.truncf %44 : vector<128x128xf32> to vector<128x128xbf16>
    %cst_32 = arith.constant dense<0.000000e+00> : vector<128x128xf32>
    %54 = tpu.matmul %0, %53, %cst_32 {dimension_numbers = #tpu.dot_dimension_numbers<[1], [0], [0], [1], [0, 0, 1, 1], [], []>} : vector<128x128xbf16>, vector<128x128xbf16>, vector<128x128xf32> -> vector<128x128xf32>
    %55 = arith.addf %54, %52 : vector<128x128xf32>
    %cst_33 = arith.constant 0.000000e+00 : f32
    %56 = vector.broadcast %cst_33 : f32 to vector<128x128xf32>
    %57 = arith.maximumf %55, %56 : vector<128x128xf32>
    %58 = arith.truncf %57 : vector<128x128xf32> to vector<128x128xbf16>
    %cst_34 = arith.constant dense<0.000000e+00> : vector<128x128xf32>
    %59 = tpu.matmul %1, %58, %cst_34 {dimension_numbers = #tpu.dot_dimension_numbers<[1], [0], [0], [1], [0, 0, 1, 1], [], []>} : vector<128x128xbf16>, vector<128x128xbf16>, vector<128x128xf32> -> vector<128x128xf32>
    %60 = arith.addf %44, %59 : vector<128x128xf32>
    %61 = arith.truncf %60 : vector<128x128xf32> to vector<128x128xbf16>
    %c1_35 = arith.constant 1 : index
    %c0_36 = arith.constant 0 : index
    %c0_37 = arith.constant 0 : index
    %62 = vector.load %arg6[%c1_35, %c0_36, %c0_37] : memref<2x128x128xbf16, #tpu.memory_space<vmem>>, vector<1x128x128xbf16>
    %63 = vector.shape_cast %62 : vector<1x128x128xbf16> to vector<128x128xbf16>
    %cst_38 = arith.constant dense<0.000000e+00> : vector<128x128xf32>
    %64 = tpu.matmul %61, %63, %cst_38 {dimension_numbers = #tpu.dot_dimension_numbers<[1], [0], [0], [1], [0, 0, 1, 1], [], []>} : vector<128x128xbf16>, vector<128x128xbf16>, vector<128x128xf32> -> vector<128x128xf32>
    %65 = vector.extract_strided_slice %46 {offsets = [1, 0], sizes = [1, 128], strides = [1, 1]} : vector<8x128xf32> to vector<1x128xf32>
    %66 = vector.broadcast %65 : vector<1x128xf32> to vector<128x128xf32>
    %67 = arith.addf %64, %66 : vector<128x128xf32>
    %68 = vector.extract_strided_slice %46 {offsets = [2, 0], sizes = [1, 128], strides = [1, 1]} : vector<8x128xf32> to vector<1x128xf32>
    %69 = vector.broadcast %68 : vector<1x128xf32> to vector<128x128xf32>
    %70 = arith.mulf %67, %69 : vector<128x128xf32>
    %71 = vector.extract_strided_slice %46 {offsets = [3, 0], sizes = [1, 128], strides = [1, 1]} : vector<8x128xf32> to vector<1x128xf32>
    %72 = vector.broadcast %71 : vector<1x128xf32> to vector<128x128xf32>
    %73 = arith.addf %70, %72 : vector<128x128xf32>
    %cst_39 = arith.constant 0.000000e+00 : f32
    %74 = vector.broadcast %cst_39 : f32 to vector<128x128xf32>
    %75 = arith.maximumf %73, %74 : vector<128x128xf32>
    %76 = arith.truncf %75 : vector<128x128xf32> to vector<128x128xbf16>
    %c1_40 = arith.constant 1 : index
    %c0_41 = arith.constant 0 : index
    %c0_42 = arith.constant 0 : index
    %77 = vector.load %arg7[%c1_40, %c0_41, %c0_42] : memref<2x128x128xbf16, #tpu.memory_space<vmem>>, vector<1x128x128xbf16>
    %78 = vector.shape_cast %77 : vector<1x128x128xbf16> to vector<128x128xbf16>
    %cst_43 = arith.constant dense<0.000000e+00> : vector<128x128xf32>
    %79 = tpu.matmul %76, %78, %cst_43 {dimension_numbers = #tpu.dot_dimension_numbers<[1], [0], [0], [1], [0, 0, 1, 1], [], []>} : vector<128x128xbf16>, vector<128x128xbf16>, vector<128x128xf32> -> vector<128x128xf32>
    %80 = vector.extract_strided_slice %46 {offsets = [4, 0], sizes = [1, 128], strides = [1, 1]} : vector<8x128xf32> to vector<1x128xf32>
    %81 = vector.broadcast %80 : vector<1x128xf32> to vector<128x128xf32>
    %82 = arith.addf %79, %81 : vector<128x128xf32>
    %cst_44 = arith.constant 0.000000e+00 : f32
    %83 = vector.broadcast %cst_44 : f32 to vector<128x128xf32>
    %84 = arith.maximumf %82, %83 : vector<128x128xf32>
    %c0_45 = arith.constant 0 : index
    %c0_46 = arith.constant 0 : index
    %85 = vector.load %arg4[%c0_45, %c0_46] : memref<8x128xf32, #tpu.memory_space<vmem>>, vector<8x128xf32>
    %cst_47 = arith.constant dense<0.000000e+00> : vector<8x128xf32>
    %86 = tpu.matmul %85, %84, %cst_47 {dimension_numbers = #tpu.dot_dimension_numbers<[1], [0], [0], [1], [0, 0, 1, 1], [], []>} : vector<8x128xf32>, vector<128x128xf32>, vector<8x128xf32> -> vector<8x128xf32>
    %c0_48 = arith.constant 0 : index
    %c0_49 = arith.constant 0 : index
    %87 = vector.load %arg12[%c0_48, %c0_49] : memref<8x128xf32, #tpu.memory_space<vmem>>, vector<8x128xf32>
    tpu.vector_store %arg12[%c0_48, %c0_49], %86 {strides = array<i32>} : memref<8x128xf32, #tpu.memory_space<vmem>>, vector<8x128xf32>,
    %c0_50 = arith.constant 0 : index
    %c0_51 = arith.constant 0 : index
    %88 = vector.load %arg10[%c0_50, %c0_51] : memref<8x128xf32, #tpu.memory_space<vmem>>, vector<8x128xf32>
    %89 = arith.truncf %86 : vector<8x128xf32> to vector<8x128xbf16>
    %c0_52 = arith.constant 0 : index
    %c0_53 = arith.constant 0 : index
    %c0_54 = arith.constant 0 : index
    %90 = vector.load %arg9[%c0_52, %c0_53, %c0_54] : memref<2x128x128xbf16, #tpu.memory_space<vmem>>, vector<1x128x128xbf16>
    %91 = vector.shape_cast %90 : vector<1x128x128xbf16> to vector<128x128xbf16>
    %cst_55 = arith.constant dense<0.000000e+00> : vector<8x128xf32>
    %92 = tpu.matmul %89, %91, %cst_55 {dimension_numbers = #tpu.dot_dimension_numbers<[1], [0], [0], [1], [0, 0, 1, 1], [], []>} : vector<8x128xbf16>, vector<128x128xbf16>, vector<8x128xf32> -> vector<8x128xf32>
    %93 = vector.extract_strided_slice %88 {offsets = [0, 0], sizes = [1, 128], strides = [1, 1]} : vector<8x128xf32> to vector<1x128xf32>
    %94 = vector.broadcast %93 : vector<1x128xf32> to vector<8x128xf32>
    %95 = arith.addf %92, %94 : vector<8x128xf32>
    %cst_56 = arith.constant 0.000000e+00 : f32
    %96 = vector.broadcast %cst_56 : f32 to vector<8x128xf32>
    %97 = arith.maximumf %95, %96 : vector<8x128xf32>
    %98 = arith.truncf %97 : vector<8x128xf32> to vector<8x128xbf16>
    %c1_57 = arith.constant 1 : index
    %c0_58 = arith.constant 0 : index
    %c0_59 = arith.constant 0 : index
    %99 = vector.load %arg9[%c1_57, %c0_58, %c0_59] : memref<2x128x128xbf16, #tpu.memory_space<vmem>>, vector<1x128x128xbf16>
    %100 = vector.shape_cast %99 : vector<1x128x128xbf16> to vector<128x128xbf16>
    %cst_60 = arith.constant dense<0.000000e+00> : vector<8x128xf32>
    %101 = tpu.matmul %98, %100, %cst_60 {dimension_numbers = #tpu.dot_dimension_numbers<[1], [0], [0], [1], [0, 0, 1, 1], [], []>} : vector<8x128xbf16>, vector<128x128xbf16>, vector<8x128xf32> -> vector<8x128xf32>
    %102 = vector.extract_strided_slice %88 {offsets = [1, 0], sizes = [1, 128], strides = [1, 1]} : vector<8x128xf32> to vector<1x128xf32>
    %103 = vector.broadcast %102 : vector<1x128xf32> to vector<8x128xf32>
    %104 = arith.addf %101, %103 : vector<8x128xf32>
    %105 = tpu.iota {dimensions = array<i32: 1>} : vector<8x128xi32>
    %c2_i32 = arith.constant 2 : i32
    %106 = vector.broadcast %c2_i32 : i32 to vector<8x128xi32>
    %107 = arith.cmpi slt, %105, %106 : vector<8x128xi32>
    %cst_61 = arith.constant -1.000000e+30 : f32
    %108 = vector.broadcast %cst_61 : f32 to vector<8x128xf32>
    %109 = arith.select %107, %104, %108 : vector<8x128xi1>, vector<8x128xf32>
    %cst_62 = arith.constant dense<0xFF800000> : vector<8xf32>
    %110 = vector.multi_reduction <maximumf>, %109, %cst_62 [1] : vector<8x128xf32> to vector<8xf32>
    %111 = vector.shape_cast %110 : vector<8xf32> to vector<8x1xf32>
    %112 = vector.broadcast %111 : vector<8x1xf32> to vector<8x128xf32>
    %113 = arith.subf %109, %112 : vector<8x128xf32>
    %114 = math.exp %113 : vector<8x128xf32>
    %cst_63 = arith.constant dense<0.000000e+00> : vector<8xf32>
    %115 = vector.multi_reduction <add>, %114, %cst_63 [1] : vector<8x128xf32> to vector<8xf32>
    %116 = vector.shape_cast %115 : vector<8xf32> to vector<8x1xf32>
    %117 = vector.broadcast %116 : vector<8x1xf32> to vector<8x128xf32>
    %118 = arith.divf %114, %117 : vector<8x128xf32>
    %c0_64 = arith.constant 0 : index
    %c0_65 = arith.constant 0 : index
    %119 = vector.load %arg11[%c0_64, %c0_65] : memref<8x128xf32, #tpu.memory_space<vmem>>, vector<8x128xf32>
    tpu.vector_store %arg11[%c0_64, %c0_65], %118 {strides = array<i32>} : memref<8x128xf32, #tpu.memory_space<vmem>>, vector<8x128xf32>,
    return
  }
}

</mosaic_0001>

<bundles_post_ra>
// kernel: tpu_custom_call.1
= control target key start
LH: loop header
LB: loop body
LE: loop exit
PB: predicated region body
PF: predicated region fallthrough
CT: control target
= control target key end

     0   :  { %18 = vsyncpa [#allocation3], 0  ;;  %s4240_s0 = inlined_call_operand.hbm [shape: bf16[128,128], index: 0, kind: input, shape index: {}]   ;;  %s4241_s1 = inlined_call_operand.hbm [shape: bf16[128,128], index: 1, kind: input, shape index: {}]   ;;  %s4242_s2 = inlined_call_operand.hbm [shape: f32[128,128], index: 2, kind: input, shape index: {}]   ;;  %s4243_s3 = inlined_call_operand.hbm [shape: f32[128,128], index: 3, kind: input, shape index: {}]   ;;  %s4244_s4 = inlined_call_operand.hbm [shape: f32[8,128], index: 4, kind: input, shape index: {}]   ;;  %s4245_s5 = inlined_call_operand.hbm [shape: bf16[2,128,128], index: 5, kind: input, shape index: {}]   ;;  %s4246_s6 = inlined_call_operand.hbm [shape: bf16[2,128,128], index: 6, kind: input, shape index: {}]   ;;  %s4247_s7 = inlined_call_operand.hbm [shape: bf16[2,128,128], index: 7, kind: input, shape index: {}]   ;;  %s4248_s8 = inlined_call_operand.hbm [shape: f32[2,8,128], index: 8, kind: input, shape index: {}]   ;;  %s4249_s9 = inlined_call_operand.hbm [shape: bf16[2,128,128], index: 9, kind: input, shape index: {}]   ;;  %s4250_s10 = inlined_call_operand.hbm [shape: f32[8,128], index: 10, kind: input, shape index: {}]   ;;  %s4251_s11 = inlined_call_operand.hbm [shape: f32[8,128], index: 11, kind: output, shape index: {0}]   ;;  %s4252_s12 = inlined_call_operand.hbm [shape: f32[8,128], index: 12, kind: output, shape index: {1}]  }
   0x1   :  { %19 = vsyncpa [#allocation6], 0 }
   0x2   :  { %20 = vsyncpa [#allocation9], 0 }
   0x3   :  { %21 = vsyncpa [#allocation12], 0 }
   0x4   :  { %22 = vsyncpa [#allocation15], 0 }
   0x5   :  { %23 = vsyncpa [#allocation18], 0 }
   0x6   :  { %24 = vsyncpa [#allocation4], 0 }
   0x7   :  { %25 = vsyncpa [#allocation22], 0  ;;  %s3517_s21 = smov [#allocation5]   ;;  %s3215_s25 = scalar_lea.hbm %s4241_s1, 1024 }
   0x8   :  { %s43_s22 = sshll.u32 %s3517_s21, 4  ;;  %p3216_p0 = scmp.ne.s32.totalorder %s4241_s1, %s3215_s25  ;;  %s44_s22 = int_to_ptr.vmem [resolvable:$true] %s43_s22 }
   0x9   :  { %p3219_p1 = scmp.lt.u32.totalorder %s3215_s25, %s4241_s1 }
   0xb   :  { %p3221_p2 = pnand %p3219_p1, %p3216_p0 }
   0xd   :  { %3224 = shalt.err (!%p3221_p2)
}
   0xe   :  { %s3225_s30 = scalar_lea.vmem %s44_s22, 1024  ;;  %p3230_p4 = scmp.lt.s32.totalorder %s44_s22, %s44_s22 }
   0xf   :  { %p3226_p3 = scmp.ne.s32.totalorder %s44_s22, %s3225_s30  ;;  %p3231_p5 = scmp.lt.s32.totalorder %s3225_s30, %s3225_s30 }
  0x11   :  { %p3232_p6 = por %p3231_p5, %p3230_p4 }
  0x13   :  { %p3233_p7 = pnand %p3232_p6, %p3226_p3 }
  0x15   :  { %3236 = shalt.err (!%p3233_p7)
}
  0x16   :  { %s3518_s13 = smov 64   ;;  %s3519_s14 = smov 4  }
  0x17   :  { %49 = dma.hbm_to_vmem [thread:$0]  %s4241_s1, 1024, %s44_s22, [#allocation6], %s3518_s13, %s3518_s13, %s3519_s14  }
  0x18   :  { %s3520_s17 = smov [#allocation8]   ;;  %s3521_s19 = smov [#allocation11]  }
  0x19   :  { %s67_s18 = sshll.u32 %s3520_s17, 4  ;;  %s89_s20 = sshll.u32 %s3521_s19, 4  ;;  %s68_s18 = int_to_ptr.vmem [resolvable:$true] %s67_s18  ;;  %s90_s20 = int_to_ptr.vmem [resolvable:$true] %s89_s20 }
  0x1a   :  { %s3237_s24 = scalar_lea.hbm %s4243_s3, 2048 }
  0x1b   :  { %p3238_p8 = scmp.ne.s32.totalorder %s4243_s3, %s3237_s24  ;;  %p3241_p9 = scmp.lt.u32.totalorder %s3237_s24, %s4243_s3 }
  0x1d   :  { %p3243_p10 = pnand %p3241_p9, %p3238_p8 }
  0x1f   :  { %3246 = shalt.err (!%p3243_p10)
}
  0x20   :  { %s3247_s1 = scalar_lea.vmem %s68_s18, 2048  ;;  %p3252_p12 = scmp.lt.s32.totalorder %s68_s18, %s68_s18 }
  0x21   :  { %p3248_p11 = scmp.ne.s32.totalorder %s68_s18, %s3247_s1  ;;  %p3253_p13 = scmp.lt.s32.totalorder %s3247_s1, %s3247_s1 }
  0x23   :  { %p3254_p0 = por %p3253_p13, %p3252_p12 }
  0x25   :  { %p3255_p1 = pnand %p3254_p0, %p3248_p11 }
  0x27   :  { %3258 = shalt.err (!%p3255_p1)
}
  0x28   :  { %s3522_s22 = smov 128   ;;  %s3523_s29 = smov 8  }
  0x29   :  { %73 = dma.hbm_to_vmem [thread:$0]  %s4243_s3, 2048, %s68_s18, [#allocation9], %s3522_s22, %s3522_s22, %s3523_s29  }
  0x2a   :  { %s3259_s19 = scalar_lea.hbm %s4245_s5, 2048 }
  0x2b   :  { %p3260_p2 = scmp.ne.s32.totalorder %s4245_s5, %s3259_s19  ;;  %p3263_p3 = scmp.lt.u32.totalorder %s3259_s19, %s4245_s5 }
  0x2d   :  { %p3265_p4 = pnand %p3263_p3, %p3260_p2 }
  0x2f   :  { %3268 = shalt.err (!%p3265_p4)
}
  0x30   :  { %s3269_s26 = scalar_lea.vmem %s90_s20, 2048  ;;  %p3274_p6 = scmp.lt.s32.totalorder %s90_s20, %s90_s20 }
  0x31   :  { %p3270_p5 = scmp.ne.s32.totalorder %s90_s20, %s3269_s26  ;;  %p3275_p7 = scmp.lt.s32.totalorder %s3269_s26, %s3269_s26 }
  0x33   :  { %p3276_p8 = por %p3275_p7, %p3274_p6 }
  0x35   :  { %p3277_p9 = pnand %p3276_p8, %p3270_p5 }
  0x37   :  { %3280 = shalt.err (!%p3277_p9)
}
  0x38   :  { %95 = dma.hbm_to_vmem [thread:$0]  %s4245_s5, 2048, %s90_s20, [#allocation12], %s3518_s13, %s3518_s13, %s3519_s14  }
  0x39   :  { %s3524_s27 = smov [#allocation14]   ;;  %s3525_s1 = smov [#allocation17]  }
  0x3a   :  { %s113_s28 = sshll.u32 %s3524_s27, 4  ;;  %s137_s30 = sshll.u32 %s3525_s1, 4  ;;  %s114_s28 = int_to_ptr.vmem [resolvable:$true] %s113_s28  ;;  %s138_s30 = int_to_ptr.vmem [resolvable:$true] %s137_s30 }
  0x3b   :  { %s3281_s17 = scalar_lea.hbm %s4247_s7, 2048 }
  0x3c   :  { %p3282_p10 = scmp.ne.s32.totalorder %s4247_s7, %s3281_s17  ;;  %p3285_p11 = scmp.lt.u32.totalorder %s3281_s17, %s4247_s7 }
  0x3e   :  { %p3287_p12 = pnand %p3285_p11, %p3282_p10 }
  0x40   :  { %3290 = shalt.err (!%p3287_p12)
}
  0x41   :  { %s3291_s5 = scalar_lea.vmem %s114_s28, 2048  ;;  %p3296_p0 = scmp.lt.s32.totalorder %s114_s28, %s114_s28 }
  0x42   :  { %p3292_p13 = scmp.ne.s32.totalorder %s114_s28, %s3291_s5  ;;  %p3297_p1 = scmp.lt.s32.totalorder %s3291_s5, %s3291_s5 }
  0x44   :  { %p3298_p2 = por %p3297_p1, %p3296_p0 }
  0x46   :  { %p3299_p3 = pnand %p3298_p2, %p3292_p13 }
  0x48   :  { %3302 = shalt.err (!%p3299_p3)
}
  0x49   :  { %119 = dma.hbm_to_vmem [thread:$0]  %s4247_s7, 2048, %s114_s28, [#allocation15], %s3518_s13, %s3518_s13, %s3519_s14  }
  0x4a   :  { %s3303_s18 = scalar_lea.hbm %s4249_s9, 2048 }
  0x4b   :  { %p3304_p4 = scmp.ne.s32.totalorder %s4249_s9, %s3303_s18  ;;  %p3307_p5 = scmp.lt.u32.totalorder %s3303_s18, %s4249_s9 }
  0x4d   :  { %p3309_p6 = pnand %p3307_p5, %p3304_p4 }
  0x4f   :  { %3312 = shalt.err (!%p3309_p6)
}
  0x50   :  { %s3313_s17 = scalar_lea.vmem %s138_s30, 2048  ;;  %p3318_p8 = scmp.lt.s32.totalorder %s138_s30, %s138_s30 }
  0x51   :  { %p3314_p7 = scmp.ne.s32.totalorder %s138_s30, %s3313_s17  ;;  %p3319_p9 = scmp.lt.s32.totalorder %s3313_s17, %s3313_s17 }
  0x53   :  { %p3320_p10 = por %p3319_p9, %p3318_p8 }
  0x55   :  { %p3321_p11 = pnand %p3320_p10, %p3314_p7 }
  0x57   :  { %3324 = shalt.err (!%p3321_p11)
}
  0x58   :  { %143 = dma.hbm_to_vmem [thread:$0]  %s4249_s9, 2048, %s138_s30, [#allocation18], %s3518_s13, %s3518_s13, %s3519_s14  }
  0x59   :  { %s3526_s19 = smov [#allocation2]   ;;  %s3527_s23 = smov [#allocation7]  }
  0x5a   :  { %s31_s21 = sshll.u32 %s3526_s19, 4  ;;  %s55_s24 = sshll.u32 %s3527_s23, 4  ;;  %s32_s21 = int_to_ptr.vmem [resolvable:$true] %s31_s21  ;;  %s56_s24 = int_to_ptr.vmem [resolvable:$true] %s55_s24 }
  0x5b   :  { %s3325_s25 = scalar_lea.hbm %s4240_s0, 1024 }
  0x5c   :  { %p3326_p12 = scmp.ne.s32.totalorder %s4240_s0, %s3325_s25  ;;  %p3329_p13 = scmp.lt.u32.totalorder %s3325_s25, %s4240_s0 }
  0x5e   :  { %p3331_p0 = pnand %p3329_p13, %p3326_p12 }
  0x60   :  { %3334 = shalt.err (!%p3331_p0)
}
  0x61   :  { %s3335_s9 = scalar_lea.vmem %s32_s21, 1024  ;;  %p3340_p2 = scmp.lt.s32.totalorder %s32_s21, %s32_s21 }
  0x62   :  { %p3336_p1 = scmp.ne.s32.totalorder %s32_s21, %s3335_s9  ;;  %p3341_p3 = scmp.lt.s32.totalorder %s3335_s9, %s3335_s9 }
  0x64   :  { %p3342_p4 = por %p3341_p3, %p3340_p2 }
  0x66   :  { %p3343_p5 = pnand %p3342_p4, %p3336_p1 }
  0x68   :  { %3346 = shalt.err (!%p3343_p5)
}
  0x69   :  { %37 = dma.hbm_to_vmem [thread:$0]  %s4240_s0, 1024, %s32_s21, [#allocation3], %s3518_s13, %s3518_s13, %s3519_s14  }
  0x6a   :  { %s3347_s17 = scalar_lea.hbm %s4242_s2, 2048 }
  0x6b   :  { %p3348_p6 = scmp.ne.s32.totalorder %s4242_s2, %s3347_s17  ;;  %p3351_p7 = scmp.lt.u32.totalorder %s3347_s17, %s4242_s2 }
  0x6d   :  { %p3353_p8 = pnand %p3351_p7, %p3348_p6 }
  0x6f   :  { %3356 = shalt.err (!%p3353_p8)
}
  0x70   :  { %s3357_s5 = scalar_lea.vmem %s56_s24, 2048  ;;  %p3362_p10 = scmp.lt.s32.totalorder %s56_s24, %s56_s24 }
  0x71   :  { %p3358_p9 = scmp.ne.s32.totalorder %s56_s24, %s3357_s5  ;;  %p3363_p11 = scmp.lt.s32.totalorder %s3357_s5, %s3357_s5 }
  0x73   :  { %p3364_p12 = por %p3363_p11, %p3362_p10 }
  0x75   :  { %p3365_p13 = pnand %p3364_p12, %p3358_p9 }
  0x77   :  { %3368 = shalt.err (!%p3365_p13)
}
  0x78   :  { %61 = dma.hbm_to_vmem [thread:$0]  %s4242_s2, 2048, %s56_s24, [#allocation6], %s3522_s22, %s3522_s22, %s3523_s29  }
  0x79   :  { %s3528_s20 = smov [#allocation10]   ;;  %s3529_s26 = smov [#allocation13]  }
  0x7a   :  { %s80_s25 = sshll.u32 %s3528_s20, 4  ;;  %s101_s3 = sshll.u32 %s3529_s26, 4  ;;  %s81_s25 = int_to_ptr.vmem [resolvable:$true] %s80_s25  ;;  %s102_s3 = int_to_ptr.vmem [resolvable:$true] %s101_s3 }
  0x7b   :  { %s3369_s9 = scalar_lea.hbm %s4244_s4, 128 }
  0x7c   :  { %p3370_p0 = scmp.ne.s32.totalorder %s4244_s4, %s3369_s9  ;;  %p3373_p1 = scmp.lt.u32.totalorder %s3369_s9, %s4244_s4 }
  0x7e   :  { %p3375_p2 = pnand %p3373_p1, %p3370_p0 }
  0x80   :  { %3378 = shalt.err (!%p3375_p2)
}
  0x81   :  { %s3379_s2 = scalar_lea.vmem %s81_s25, 128  ;;  %p3384_p4 = scmp.lt.s32.totalorder %s81_s25, %s81_s25 }
  0x82   :  { %p3380_p3 = scmp.ne.s32.totalorder %s81_s25, %s3379_s2  ;;  %p3385_p5 = scmp.lt.s32.totalorder %s3379_s2, %s3379_s2 }
  0x84   :  { %p3386_p6 = por %p3385_p5, %p3384_p4 }
  0x86   :  { %p3387_p7 = pnand %p3386_p6, %p3380_p3 }
  0x88   :  { %3390 = shalt.err (!%p3387_p7)
}
  0x89   :  { %83 = dma.hbm_to_vmem [thread:$0]  %s4244_s4, 128, %s81_s25, [#allocation9]  }
  0x8a   :  { %s3391_s19 = scalar_lea.hbm %s4246_s6, 2048 }
  0x8b   :  { %p3392_p8 = scmp.ne.s32.totalorder %s4246_s6, %s3391_s19  ;;  %p3395_p9 = scmp.lt.u32.totalorder %s3391_s19, %s4246_s6 }
  0x8d   :  { %p3397_p10 = pnand %p3395_p9, %p3392_p8 }
  0x8f   :  { %3400 = shalt.err (!%p3397_p10)
}
  0x90   :  { %s3401_s20 = scalar_lea.vmem %s102_s3, 2048  ;;  %p3406_p12 = scmp.lt.s32.totalorder %s102_s3, %s102_s3 }
  0x91   :  { %p3402_p11 = scmp.ne.s32.totalorder %s102_s3, %s3401_s20  ;;  %p3407_p13 = scmp.lt.s32.totalorder %s3401_s20, %s3401_s20 }
  0x93   :  { %p3408_p0 = por %p3407_p13, %p3406_p12 }
  0x95   :  { %p3409_p1 = pnand %p3408_p0, %p3402_p11 }
  0x97   :  { %3412 = shalt.err (!%p3409_p1)
}
  0x98   :  { %107 = dma.hbm_to_vmem [thread:$0]  %s4246_s6, 2048, %s102_s3, [#allocation12], %s3518_s13, %s3518_s13, %s3519_s14  }
  0x99   :  { %s3530_s26 = smov [#allocation16]   ;;  %s3531_s27 = smov [#allocation19]  }
  0x9a   :  { %s125_s18 = sshll.u32 %s3530_s26, 4  ;;  %s150_s9 = sshll.u32 %s3531_s27, 4  ;;  %s126_s18 = int_to_ptr.vmem [resolvable:$true] %s125_s18  ;;  %s151_s9 = int_to_ptr.vmem [resolvable:$true] %s150_s9 }
  0x9b   :  { %s3413_s15 = scalar_lea.hbm %s4248_s8, 256 }
  0x9c   :  { %p3414_p2 = scmp.ne.s32.totalorder %s4248_s8, %s3413_s15  ;;  %p3417_p3 = scmp.lt.u32.totalorder %s3413_s15, %s4248_s8 }
  0x9e   :  { %p3419_p4 = pnand %p3417_p3, %p3414_p2 }
  0xa0   :  { %3422 = shalt.err (!%p3419_p4)
}
  0xa1   :  { %s3423_s6 = scalar_lea.vmem %s126_s18, 256  ;;  %p3428_p6 = scmp.lt.s32.totalorder %s126_s18, %s126_s18 }
  0xa2   :  { %p3424_p5 = scmp.ne.s32.totalorder %s126_s18, %s3423_s6  ;;  %p3429_p7 = scmp.lt.s32.totalorder %s3423_s6, %s3423_s6 }
  0xa4   :  { %p3430_p8 = por %p3429_p7, %p3428_p6 }
  0xa6   :  { %p3431_p9 = pnand %p3430_p8, %p3424_p5 }
  0xa8   :  { %3434 = shalt.err (!%p3431_p9)
}
  0xa9   :  { %131 = dma.hbm_to_vmem [thread:$0]  %s4248_s8, 256, %s126_s18, [#allocation15], %s3522_s22, %s3522_s22, %s3523_s29  }
  0xaa   :  { %s3435_s28 = scalar_lea.hbm %s4250_s10, 128 }
  0xab   :  { %p3436_p10 = scmp.ne.s32.totalorder %s4250_s10, %s3435_s28  ;;  %p3439_p11 = scmp.lt.u32.totalorder %s3435_s28, %s4250_s10 }
  0xad   :  { %p3441_p12 = pnand %p3439_p11, %p3436_p10 }
  0xaf   :  { %3444 = shalt.err (!%p3441_p12)
}
  0xb0   :  { %s3445_s21 = scalar_lea.vmem %s151_s9, 128  ;;  %p3450_p0 = scmp.lt.s32.totalorder %s151_s9, %s151_s9 }
  0xb1   :  { %p3446_p13 = scmp.ne.s32.totalorder %s151_s9, %s3445_s21  ;;  %p3451_p1 = scmp.lt.s32.totalorder %s3445_s21, %s3445_s21 }
  0xb3   :  { %p3452_p2 = por %p3451_p1, %p3450_p0 }
  0xb5   :  { %p3453_p3 = pnand %p3452_p2, %p3446_p13 }
  0xb7   :  { %3456 = shalt.err (!%p3453_p3)
}
  0xb8   :  { %153 = dma.hbm_to_vmem [thread:$0]  %s4250_s10, 128, %s151_s9, [#allocation18]  }
  0xb9   :  { %3501 = dma.done.wait [#allocation3], 1024  }
  0xba   :  { %3502 = vsyncadd [#allocation3], 4294966272 }
  0xbb   :  { %3503 = dma.done.wait [#allocation6], 3072  }
  0xbc   :  { %3504 = vsyncadd [#allocation6], 4294964224 }
  0xbd   :  { %3505 = dma.done.wait [#allocation9], 2176  }
  0xbe   :  { %3506 = vsyncadd [#allocation9], 4294965120 }
  0xbf   :  { %3507 = dma.done.wait [#allocation12], 4096  }
  0xc0   :  { %3508 = vsyncadd [#allocation12], 4294963200 }
  0xc1   :  { %3509 = dma.done.wait [#allocation15], 2304  }
  0xc2   :  { %3510 = vsyncadd [#allocation15], 4294964992 }
  0xc3   :  { %3511 = dma.done.wait [#allocation18], 2176  }
  0xc4   :  { %3512 = vsyncadd [#allocation18], 4294965120  ;;  %v3131_v0 = vld [vmem:[#allocation11] sm:$0xff]   ;;  %v3132_v1 = vld [vmem:[#allocation11 + $0x8] sm:$0xff]   ;;  %vm3533_vm0 = vmmov 0   ;;  %s3535_s10 = smov [#allocation21]  }
  0xc5   :  { %2628 = vmatprep.subr.bf16.mxu0 %v3131_v0  ;;  %v3133_v2 = vld [vmem:[#allocation11 + $0x10] sm:$0xff]   ;;  %v3134_v3 = vld [vmem:[#allocation11 + $0x18] sm:$0xff]   ;;  %v221_v5 = vld [vmem:[#allocation8 + $0x8] sm:$0xff]  ;;  %s2335_s29 = sshll.u32 %s3535_s10, 4  ;;  %s2336_s29 = int_to_ptr.vmem [resolvable:$true] %s2335_s29 }
  0xc6   :  { %2629 = vmatpush3.bf16.msra.mxu0 %v3131_v0  ;;  %v220_v4 = vld [vmem:[#allocation8] sm:$0xff]  ;;  %v3135_v7 = vld [vmem:[#allocation11 + $0x20] sm:$0xff]   ;;  %v3136_v8 = vld [vmem:[#allocation11 + $0x28] sm:$0xff]   ;;  %s3457_s20 = scalar_lea.vmem %s2336_s29, 128  ;;  %p3462_p5 = scmp.lt.s32.totalorder %s2336_s29, %s2336_s29 }
  0xc7   :  { %2630 = vmatprep.subr.bf16.mxu0 %v3132_v1  ;;  %v3761_v6 = vpack.c.bf16 %v221_v5, %v220_v4  ;;  %v3137_v9 = vld [vmem:[#allocation11 + $0x30] sm:$0xff]   ;;  %v3138_v10 = vld [vmem:[#allocation11 + $0x38] sm:$0xff]   ;;  %v222_v12 = vld [vmem:[#allocation8 + $0x10] sm:$0xff]  ;;  %p3458_p4 = scmp.ne.s32.totalorder %s2336_s29, %s3457_s20  ;;  %p3463_p6 = scmp.lt.s32.totalorder %s3457_s20, %s3457_s20 }
  0xc8   :  { %v3764_v11 = vld [vmem:[#allocation7] sm:$0xff]  ;;  %v223_v13 = vld [vmem:[#allocation8 + $0x18] sm:$0xff]  ;;  %v3766_v14 = vld [vmem:[#allocation7 + $0x8] sm:$0xff] }
  0xc9   :  { %2644 = vmatprep.mubr.bf16.mxu0 %v3761_v6  ;;  %v224_v15 = vld [vmem:[#allocation8 + $0x20] sm:$0xff]  ;;  %v225_v16 = vld [vmem:[#allocation8 + $0x28] sm:$0xff]  ;;  %v3768_v17 = vld [vmem:[#allocation7 + $0x10] sm:$0xff]  ;;  %v426_v19 = vpack.c.bf16 %v3766_v14, %v3764_v11  ;;  %v3774_v20 = vpack.c.bf16 %v223_v13, %v222_v12  ;;  %p3464_p7 = por %p3463_p6, %p3462_p5 }
  0xca   :  { %2631 = vmatpush3.bf16.msra.mxu0 %v3132_v1  ;;  %v3770_v18 = vld [vmem:[#allocation7 + $0x18] sm:$0xff]  ;;  %v3776_v21 = vpack.c.bf16 %v225_v16, %v224_v15  ;;  %v3778_v22 = vld [vmem:[#allocation7 + $0x20] sm:$0xff]  ;;  %v3780_v23 = vld [vmem:[#allocation7 + $0x28] sm:$0xff]  ;;  %v4253_v1 = vlaneseq }
  0xcb   :  { %2632 = vmatprep.subr.bf16.mxu0 %v3133_v2  ;;  %v427_v24 = vpack.c.bf16 %v3770_v18, %v3768_v17  ;;  %v226_v25 = vld [vmem:[#allocation8 + $0x30] sm:$0xff]  ;;  %v227_v26 = vld [vmem:[#allocation8 + $0x38] sm:$0xff]  ;;  %v228_v27 = vld [vmem:[#allocation8 + $0x40] sm:$0xff]  ;;  %v428_v31 = vpack.c.bf16 %v3780_v23, %v3778_v22  ;;  %p3465_p8 = pnand %p3464_p7, %p3458_p4 }
  0xcc   :  { %v229_v28 = vld [vmem:[#allocation8 + $0x48] sm:$0xff]  ;;  %v3786_v29 = vld [vmem:[#allocation7 + $0x30] sm:$0xff]  ;;  %v3788_v30 = vld [vmem:[#allocation7 + $0x38] sm:$0xff]  ;;  %v3792_v32 = vpack.c.bf16 %v227_v26, %v226_v25 }
  0xcd   :  { %v3794_v33 = vpack.c.bf16 %v229_v28, %v228_v27  ;;  %v3796_v34 = vld [vmem:[#allocation7 + $0x40] sm:$0xff]  ;;  %v3798_v35 = vld [vmem:[#allocation7 + $0x48] sm:$0xff]  ;;  %v429_v36 = vpack.c.bf16 %v3788_v30, %v3786_v29  ;;  %v230_v37 = vld [vmem:[#allocation8 + $0x50] sm:$0xff] }
  0xce   :  { %2633 = vmatpush3.bf16.msra.mxu0 %v3133_v2  ;;  %v231_v38 = vld [vmem:[#allocation8 + $0x58] sm:$0xff]  ;;  %v232_v39 = vld [vmem:[#allocation8 + $0x60] sm:$0xff]  ;;  %v233_v40 = vld [vmem:[#allocation8 + $0x68] sm:$0xff]  ;;  %v430_v43 = vpack.c.bf16 %v3798_v35, %v3796_v34  ;;  %v3861_v2 = vshrl.u32 %v4253_v1, 7 }
  0xcf   :  { %2634 = vmatprep.subr.bf16.mxu0 %v3134_v3  ;;  %v3804_v41 = vld [vmem:[#allocation7 + $0x50] sm:$0xff]  ;;  %v3806_v42 = vld [vmem:[#allocation7 + $0x58] sm:$0xff]  ;;  %v3810_v44 = vpack.c.bf16 %v231_v38, %v230_v37  ;;  %v3812_v45 = vpack.c.bf16 %v233_v40, %v232_v39  ;;  %v3814_v46 = vld [vmem:[#allocation7 + $0x60] sm:$0xff] }
  0xd0   :  { %v3816_v47 = vld [vmem:[#allocation7 + $0x68] sm:$0xff]  ;;  %v431_v48 = vpack.c.bf16 %v3806_v42, %v3804_v41  ;;  %v234_v49 = vld [vmem:[#allocation8 + $0x70] sm:$0xff]  ;;  %v235_v50 = vld [vmem:[#allocation8 + $0x78] sm:$0xff] }
  0xd1   :  { %v3822_v51 = vld [vmem:[#allocation7 + $0x70] sm:$0xff]  ;;  %v3824_v52 = vld [vmem:[#allocation7 + $0x78] sm:$0xff]  ;;  %v432_v53 = vpack.c.bf16 %v3816_v47, %v3814_v46  ;;  %v3828_v54 = vld [vmem:[#allocation2] sm:$0xff]   ;;  %v3830_v55 = vpack.c.bf16 %v235_v50, %v234_v49 }
  0xd2   :  { %2635 = vmatpush3.bf16.msra.mxu0 %v3134_v3  ;;  %v433_v56 = vpack.c.bf16 %v3824_v52, %v3822_v51  ;;  %v3836_v57 = vld [vmem:[#allocation2 + $0x8] sm:$0xff]   ;;  %v3838_v58 = vld [vmem:[#allocation2 + $0x10] sm:$0xff]   ;;  %v3842_v59 = vld [vmem:[#allocation2 + $0x18] sm:$0xff]   ;;  %v3864_v3 = vsub.s32 0, %v3861_v2 }
  0xd3   :  { %2636 = vmatprep.subr.bf16.mxu0 %v3135_v7  ;;  %v3844_v60 = vld [vmem:[#allocation2 + $0x20] sm:$0xff]   ;;  %v3848_v61 = vld [vmem:[#allocation2 + $0x28] sm:$0xff]   ;;  %v3850_v62 = vld [vmem:[#allocation2 + $0x30] sm:$0xff]  }
  0xd4   :  { %v3854_v63 = vld [vmem:[#allocation2 + $0x38] sm:$0xff]   ;;  %v3857_v0 = vld [vmem:[#allocation5] sm:$0xff]   ;;  %v3866_v4 = vld [vmem:[#allocation16] sm:$0xff] }
  0xd5   :  { %2708 = vmatprep.mubr.bf16.mxu1 %v3857_v0  ;;  %v280_v5 = vrot.slane %v3866_v4, %v3864_v3 }
  0xd6   :  { %2637 = vmatpush3.bf16.msra.mxu0 %v3135_v7 }
  0xd7   :  { %2638 = vmatprep.subr.bf16.mxu0 %v3136_v8 }
  0xda   :  { %2639 = vmatpush3.bf16.msra.mxu0 %v3136_v8 }
  0xdb   :  { %2640 = vmatprep.subr.bf16.mxu0 %v3137_v9 }
  0xde   :  { %2641 = vmatpush3.bf16.msra.mxu0 %v3137_v9 }
  0xdf   :  { %2642 = vmatprep.subr.bf16.mxu0 %v3138_v10 }
  0xe2   :  { %2643 = vmatpush3.bf16.msra.mxu0 %v3138_v10 }
  0xe3   :  { %2660 = vmatprep.subr.bf16.mxu0 %v426_v19 }
  0xe5   :  { %2645 = vmatmul.mubr.bf16.vlgmr.msra.gmra.mrb[0].mxu0 %v3774_v20 }
  0xe6   :  { %2661 = vmatpush3.bf16.msra.mxu0 %v426_v19  ;;  %2648 = vmatprep.mubr.bf16.mxu0 %v3776_v21 }
  0xe7   :  { %2662 = vmatprep.subr.bf16.mxu0 %v427_v24 }
  0xea   :  { %2663 = vmatpush3.bf16.msra.mxu0 %v427_v24 }
  0xeb   :  { %2664 = vmatprep.subr.bf16.mxu0 %v428_v31 }
  0xed   :  { %2649 = vmatmul.mubr.bf16.gmra.mrb[4].mxu0 %v3792_v32 }
  0xee   :  { %2665 = vmatpush3.bf16.msra.mxu0 %v428_v31  ;;  %2652 = vmatprep.mubr.bf16.mxu0 %v3794_v33 }
  0xef   :  { %2666 = vmatprep.subr.bf16.mxu0 %v429_v36 }
  0xf2   :  { %2667 = vmatpush3.bf16.msra.mxu0 %v429_v36 }
  0xf3   :  { %2668 = vmatprep.subr.bf16.mxu0 %v430_v43 }
  0xf5   :  { %2653 = vmatmul.mubr.bf16.gmra.mrb[8].mxu0 %v3810_v44 }
  0xf6   :  { %2669 = vmatpush3.bf16.msra.mxu0 %v430_v43  ;;  %2656 = vmatprep.mubr.bf16.mxu0 %v3812_v45 }
  0xf7   :  { %2670 = vmatprep.subr.bf16.mxu0 %v431_v48 }
  0xfa   :  { %2671 = vmatpush3.bf16.msra.mxu0 %v431_v48 }
  0xfb   :  { %2672 = vmatprep.subr.bf16.mxu0 %v432_v53 }
  0xfd   :  { %2657 = vmatmul.mubr.bf16.gmra.mrb[12].mxu0 %v3830_v55 }
  0xfe   :  { %2673 = vmatpush3.bf16.msra.mxu0 %v432_v53  ;;  %2676 = vmatprep.mubr.bf16.mxu0 %v3828_v54 }
  0xff   :  { %2674 = vmatprep.subr.bf16.mxu0 %v433_v56 }
 0x102   :  { %2675 = vmatpush3.bf16.msra.mxu0 %v433_v56 }
 0x105   :  { %2677 = vmatmul.mubr.bf16.vlgmr.msra.gmra.mrb[0].mxu0 %v3836_v57 }
 0x106   :  { %2680 = vmatprep.mubr.bf16.mxu0 %v3838_v58 }
 0x10d   :  { %2681 = vmatmul.mubr.bf16.gmra.mrb[4].mxu0 %v3842_v59 }
 0x10e   :  { %2684 = vmatprep.mubr.bf16.mxu0 %v3844_v60 }
 0x115   :  { %2685 = vmatmul.mubr.bf16.gmra.mrb[8].mxu0 %v3848_v61 }
 0x116   :  { %2688 = vmatprep.mubr.bf16.mxu0 %v3850_v62 }
 0x11d   :  { %2689 = vmatmul.mubr.bf16.gmra.mrb[12].mxu0 %v3854_v63 }
 0x1d8   :  { %v2678_v7 = vpop.f32.mrb[0].mxu0 }
 0x1d9   :  { %v3047_v8 = vadd.f32 %v2678_v7, %v280_v5  ;;  %v516_v9 = vpop.f32.mrb[1].mxu0 }
 0x1da   :  { %v3048_v10 = vadd.f32 %v516_v9, %v280_v5  ;;  %v2679_v12 = vpop.f32.mrb[2].mxu0 }
 0x1db   :  { %v3049_v13 = vadd.f32 %v2679_v12, %v280_v5  ;;  %v519_v15 = vpop.f32.mrb[3].mxu0  ;;  %v581_v19 = vmax.f32 %v3047_v8, 0.0 }
 0x1dc   :  { %v3050_v16 = vadd.f32 %v519_v15, %v280_v5  ;;  %v579_v25 = vmax.f32 %v3048_v10, 0.0 }
 0x1dd   :  { %v582_v24 = vmax.f32 %v3049_v13, 0.0 }
 0x1de   :  { %v580_v26 = vmax.f32 %v3050_v16, 0.0 }
 0x1df   :  { %v596_v27 = vpack.c.bf16 %v582_v24, %v581_v19 }
 0x1e0   :  { %v2682_v28 = vpop.f32.mrb[4].mxu0  ;;  %v595_v31 = vpack.c.bf16 %v580_v26, %v579_v25 }
 0x1e1   :  { %v3051_v36 = vadd.f32 %v2682_v28, %v280_v5  ;;  %v532_v37 = vpop.f32.mrb[5].mxu0 }
 0x1e2   :  { %v3052_v38 = vadd.f32 %v532_v37, %v280_v5  ;;  %v2683_v39 = vpop.f32.mrb[6].mxu0  ;;  %2692 = vmatprep.subr.bf16.mxu1 %v595_v31 }
 0x1e3   :  { %v3053_v40 = vadd.f32 %v2683_v39, %v280_v5  ;;  %v535_v43 = vpop.f32.mrb[7].mxu0  ;;  %2693 = vmatpush3.bf16.msra.mxu1 %v595_v31  ;;  %v585_v49 = vmax.f32 %v3051_v36, 0.0 }
 0x1e4   :  { %v3054_v48 = vadd.f32 %v535_v43, %v280_v5  ;;  %2694 = vmatprep.subr.bf16.mxu1 %v596_v27  ;;  %v583_v53 = vmax.f32 %v3052_v38, 0.0 }
 0x1e5   :  { %v586_v50 = vmax.f32 %v3053_v40, 0.0 }
 0x1e6   :  { %v584_v56 = vmax.f32 %v3054_v48, 0.0 }
 0x1e7   :  { %v598_v7 = vpack.c.bf16 %v586_v50, %v585_v49  ;;  %2695 = vmatpush3.bf16.msra.mxu1 %v596_v27 }
 0x1e8   :  { %v597_v8 = vpack.c.bf16 %v584_v56, %v583_v53  ;;  %v2686_v9 = vpop.f32.mrb[8].mxu0 }
 0x1e9   :  { %v3055_v10 = vadd.f32 %v2686_v9, %v280_v5  ;;  %v548_v12 = vpop.f32.mrb[9].mxu0 }
 0x1ea   :  { %v3056_v13 = vadd.f32 %v548_v12, %v280_v5  ;;  %v2687_v15 = vpop.f32.mrb[10].mxu0  ;;  %2696 = vmatprep.subr.bf16.mxu1 %v597_v8 }
 0x1eb   :  { %v3057_v16 = vadd.f32 %v2687_v15, %v280_v5  ;;  %v551_v19 = vpop.f32.mrb[11].mxu0  ;;  %2697 = vmatpush3.bf16.msra.mxu1 %v597_v8  ;;  %v589_v25 = vmax.f32 %v3055_v10, 0.0  ;;  %v3872_v15 = vld [vmem:[#allocation5 + $0x10] sm:$0xff]  }
 0x1ec   :  { %v3058_v24 = vadd.f32 %v551_v19, %v280_v5  ;;  %2698 = vmatprep.subr.bf16.mxu1 %v598_v7  ;;  %v587_v28 = vmax.f32 %v3056_v13, 0.0  ;;  %v3870_v13 = vld [vmem:[#allocation5 + $0x8] sm:$0xff]   ;;  %v3876_v19 = vld [vmem:[#allocation5 + $0x18] sm:$0xff]  }
 0x1ed   :  { %v590_v26 = vmax.f32 %v3057_v16, 0.0  ;;  %v3156_v16 = vld [vmem:[#allocation13 + $0x8] sm:$0xff]  }
 0x1ee   :  { %v588_v31 = vmax.f32 %v3058_v24, 0.0  ;;  %v3878_v24 = vld [vmem:[#allocation5 + $0x20] sm:$0xff]  }
 0x1ef   :  { %v600_v36 = vpack.c.bf16 %v590_v26, %v589_v25  ;;  %2699 = vmatpush3.bf16.msra.mxu1 %v598_v7  ;;  %v3155_v7 = vld [vmem:[#allocation13] sm:$0xff]   ;;  %v3158_v25 = vld [vmem:[#allocation13 + $0x18] sm:$0xff]  }
 0x1f0   :  { %v599_v37 = vpack.c.bf16 %v588_v31, %v587_v28  ;;  %v2690_v27 = vpop.f32.mrb[12].mxu0  ;;  %v3159_v26 = vld [vmem:[#allocation13 + $0x20] sm:$0xff]   ;;  %v3884_v31 = vld [vmem:[#allocation5 + $0x30] sm:$0xff]  }
 0x1f1   :  { %v3059_v38 = vadd.f32 %v2690_v27, %v280_v5  ;;  %v564_v39 = vpop.f32.mrb[13].mxu0  ;;  %v3882_v28 = vld [vmem:[#allocation5 + $0x28] sm:$0xff]   ;;  %v3161_v27 = vld [vmem:[#allocation13 + $0x30] sm:$0xff]  }
 0x1f2   :  { %v3060_v40 = vadd.f32 %v564_v39, %v280_v5  ;;  %v2691_v43 = vpop.f32.mrb[14].mxu0  ;;  %2700 = vmatprep.subr.bf16.mxu1 %v599_v37  ;;  %v3163_v39 = vld [vmem:[#allocation14] sm:$0xff]  }
 0x1f3   :  { %v3061_v48 = vadd.f32 %v2691_v43, %v280_v5  ;;  %v567_v49 = vpop.f32.mrb[15].mxu0  ;;  %2701 = vmatpush3.bf16.msra.mxu1 %v599_v37  ;;  %v593_v53 = vmax.f32 %v3059_v38, 0.0  ;;  %v3888_v37 = vld [vmem:[#allocation5 + $0x38] sm:$0xff]   ;;  %v3162_v38 = vld [vmem:[#allocation13 + $0x38] sm:$0xff]   ;;  %2756 = vmatprep.subr.bf16.mxu0 %v3163_v39 }
 0x1f4   :  { %v3062_v50 = vadd.f32 %v567_v49, %v280_v5  ;;  %2702 = vmatprep.subr.bf16.mxu1 %v600_v36  ;;  %v591_v8 = vmax.f32 %v3060_v40, 0.0  ;;  %v3157_v5 = vld [vmem:[#allocation13 + $0x10] sm:$0xff]   ;;  %v3164_v40 = vld [vmem:[#allocation14 + $0x8] sm:$0xff]   ;;  %2757 = vmatpush3.bf16.msra.mxu0 %v3163_v39  ;;  %v3167_v49 = vld [vmem:[#allocation14 + $0x20] sm:$0xff]  }
 0x1f5   :  { %v594_v56 = vmax.f32 %v3061_v48, 0.0  ;;  %2758 = vmatprep.subr.bf16.mxu0 %v3164_v40  ;;  %v3165_v43 = vld [vmem:[#allocation14 + $0x10] sm:$0xff]   ;;  %v3166_v48 = vld [vmem:[#allocation14 + $0x18] sm:$0xff]  }
 0x1f6   :  { %v592_v9 = vmax.f32 %v3062_v50, 0.0 }
 0x1f7   :  { %v602_v10 = vpack.c.bf16 %v594_v56, %v593_v53  ;;  %2703 = vmatpush3.bf16.msra.mxu1 %v600_v36  ;;  %v3160_v36 = vld [vmem:[#allocation13 + $0x28] sm:$0xff]  }
 0x1f8   :  { %v601_v12 = vpack.c.bf16 %v592_v9, %v591_v8  ;;  %2759 = vmatpush3.bf16.msra.mxu0 %v3164_v40 }
 0x1f9   :  { %2760 = vmatprep.subr.bf16.mxu0 %v3165_v43 }
 0x1fa   :  { %2704 = vmatprep.subr.bf16.mxu1 %v601_v12 }
 0x1fb   :  { %2705 = vmatpush3.bf16.msra.mxu1 %v601_v12 }
 0x1fc   :  { %2706 = vmatprep.subr.bf16.mxu1 %v602_v10  ;;  %2761 = vmatpush3.bf16.msra.mxu0 %v3165_v43 }
 0x1fd   :  { %2762 = vmatprep.subr.bf16.mxu0 %v3166_v48 }
 0x1ff   :  { %2707 = vmatpush3.bf16.msra.mxu1 %v602_v10 }
 0x200   :  { %2724 = vmatprep.subr.bf16.mxu1 %v3155_v7  ;;  %2763 = vmatpush3.bf16.msra.mxu0 %v3166_v48 }
 0x201   :  { %2764 = vmatprep.subr.bf16.mxu0 %v3167_v49 }
 0x202   :  { %2709 = vmatmul.mubr.bf16.vlgmr.msra.gmra.mrb[0].mxu1 %v3870_v13 }
 0x203   :  { %2712 = vmatprep.mubr.bf16.mxu1 %v3872_v15  ;;  %2725 = vmatpush3.bf16.msra.mxu1 %v3155_v7 }
 0x204   :  { %2726 = vmatprep.subr.bf16.mxu1 %v3156_v16  ;;  %2765 = vmatpush3.bf16.msra.mxu0 %v3167_v49 }
 0x207   :  { %2727 = vmatpush3.bf16.msra.mxu1 %v3156_v16 }
 0x208   :  { %2728 = vmatprep.subr.bf16.mxu1 %v3157_v5 }
 0x20a   :  { %2713 = vmatmul.mubr.bf16.gmra.mrb[4].mxu1 %v3876_v19 }
 0x20b   :  { %2716 = vmatprep.mubr.bf16.mxu1 %v3878_v24  ;;  %2729 = vmatpush3.bf16.msra.mxu1 %v3157_v5 }
 0x20c   :  { %2730 = vmatprep.subr.bf16.mxu1 %v3158_v25 }
 0x20f   :  { %2731 = vmatpush3.bf16.msra.mxu1 %v3158_v25 }
 0x210   :  { %2732 = vmatprep.subr.bf16.mxu1 %v3159_v26 }
 0x212   :  { %2717 = vmatmul.mubr.bf16.gmra.mrb[8].mxu1 %v3882_v28 }
 0x213   :  { %2720 = vmatprep.mubr.bf16.mxu1 %v3884_v31  ;;  %2733 = vmatpush3.bf16.msra.mxu1 %v3159_v26 }
 0x214   :  { %2734 = vmatprep.subr.bf16.mxu1 %v3160_v36 }
 0x217   :  { %2735 = vmatpush3.bf16.msra.mxu1 %v3160_v36 }
 0x218   :  { %2736 = vmatprep.subr.bf16.mxu1 %v3161_v27 }
 0x21a   :  { %2721 = vmatmul.mubr.bf16.gmra.mrb[12].mxu1 %v3888_v37 }
 0x21b   :  { %2737 = vmatpush3.bf16.msra.mxu1 %v3161_v27 }
 0x21c   :  { %2738 = vmatprep.subr.bf16.mxu1 %v3162_v38 }
 0x21f   :  { %2739 = vmatpush3.bf16.msra.mxu1 %v3162_v38 }
 0x2d5   :  { %v2710_v50 = vpop.f32.mrb[0].mxu1 }
 0x2d6   :  { %v685_v53 = vpop.f32.mrb[1].mxu1  ;;  %v750_v8 = vadd.f32 %v2710_v50, %v3768_v17 }
 0x2d7   :  { %v2711_v56 = vpop.f32.mrb[2].mxu1  ;;  %v748_v12 = vadd.f32 %v685_v53, %v3764_v11 }
 0x2d8   :  { %v751_v9 = vadd.f32 %v2711_v56, %v3770_v18  ;;  %v688_v10 = vpop.f32.mrb[3].mxu1 }
 0x2d9   :  { %v749_v7 = vadd.f32 %v688_v10, %v3766_v14 }
 0x2da   :  { %v765_v16 = vpack.c.bf16 %v751_v9, %v750_v8 }
 0x2db   :  { %v764_v5 = vpack.c.bf16 %v749_v7, %v748_v12 }
 0x2dd   :  { %v2714_v25 = vpop.f32.mrb[4].mxu1  ;;  %2740 = vmatprep.mubr.bf16.mxu1 %v764_v5  ;;  %v3169_v5 = vld [vmem:[#allocation14 + $0x30] sm:$0xff]  }
 0x2de   :  { %v701_v26 = vpop.f32.mrb[5].mxu1  ;;  %2741 = vmatmul.mubr.bf16.vlgmr.msra.gmra.mrb[16].mxu1 %v765_v16  ;;  %v754_v27 = vadd.f32 %v2714_v25, %v3786_v29  ;;  %v3172_v25 = vld [vmem:[#allocation11 + $0x48] sm:$0xff]  }
 0x2df   :  { %v2715_v36 = vpop.f32.mrb[6].mxu1  ;;  %v752_v17 = vadd.f32 %v701_v26, %v3778_v22  ;;  %v3176_v26 = vld [vmem:[#allocation11 + $0x68] sm:$0xff]  }
 0x2e0   :  { %v755_v38 = vadd.f32 %v2715_v36, %v3788_v30  ;;  %v704_v39 = vpop.f32.mrb[7].mxu1  ;;  %v3909_v36 = vsub.s32 1, %v3861_v2 }
 0x2e1   :  { %v753_v18 = vadd.f32 %v704_v39, %v3780_v23  ;;  %v4255_v39 = vsub.s32 3, %v3861_v2 }
 0x2e2   :  { %v767_v40 = vpack.c.bf16 %v755_v38, %v754_v27  ;;  %v4256_v27 = vsub.s32 2, %v3861_v2  ;;  %v3914_v38 = vrot.slane %v3866_v4, %v3909_v36 }
 0x2e3   :  { %v766_v11 = vpack.c.bf16 %v753_v18, %v752_v17 }
 0x2e4   :  { %v3920_v17 = vrot.slane %v3866_v4, %v4256_v27 }
 0x2e5   :  { %v2718_v43 = vpop.f32.mrb[8].mxu1  ;;  %2744 = vmatprep.mubr.bf16.mxu1 %v766_v11  ;;  %v3926_v11 = vrot.slane %v3866_v4, %v4255_v39 }
 0x2e6   :  { %v717_v14 = vpop.f32.mrb[9].mxu1  ;;  %2745 = vmatmul.mubr.bf16.gmra.mrb[20].mxu1 %v767_v40  ;;  %v758_v49 = vadd.f32 %v2718_v43, %v3804_v41 }
 0x2e7   :  { %v2719_v48 = vpop.f32.mrb[10].mxu1  ;;  %v756_v29 = vadd.f32 %v717_v14, %v3796_v34 }
 0x2e8   :  { %v759_v50 = vadd.f32 %v2719_v48, %v3806_v42  ;;  %v720_v53 = vpop.f32.mrb[11].mxu1 }
 0x2e9   :  { %v757_v30 = vadd.f32 %v720_v53, %v3798_v35  ;;  %v3168_v35 = vld [vmem:[#allocation14 + $0x28] sm:$0xff]  }
 0x2ea   :  { %v769_v56 = vpack.c.bf16 %v759_v50, %v758_v49  ;;  %2766 = vmatprep.subr.bf16.mxu0 %v3168_v35 }
 0x2eb   :  { %v768_v22 = vpack.c.bf16 %v757_v30, %v756_v29  ;;  %2767 = vmatpush3.bf16.msra.mxu0 %v3168_v35 }
 0x2ec   :  { %2768 = vmatprep.subr.bf16.mxu0 %v3169_v5 }
 0x2ed   :  { %v2722_v8 = vpop.f32.mrb[12].mxu1  ;;  %2748 = vmatprep.mubr.bf16.mxu1 %v768_v22 }
 0x2ee   :  { %v733_v23 = vpop.f32.mrb[13].mxu1  ;;  %2749 = vmatmul.mubr.bf16.gmra.mrb[24].mxu1 %v769_v56  ;;  %v762_v10 = vadd.f32 %v2722_v8, %v3822_v51  ;;  %v3170_v51 = vld [vmem:[#allocation14 + $0x38] sm:$0xff]  }
 0x2ef   :  { %v2723_v9 = vpop.f32.mrb[14].mxu1  ;;  %v760_v41 = vadd.f32 %v733_v23, %v3814_v46  ;;  %2769 = vmatpush3.bf16.msra.mxu0 %v3169_v5  ;;  %v3173_v46 = vld [vmem:[#allocation11 + $0x50] sm:$0xff]  }
 0x2f0   :  { %v763_v12 = vadd.f32 %v2723_v9, %v3824_v52  ;;  %v736_v7 = vpop.f32.mrb[15].mxu1  ;;  %2770 = vmatprep.subr.bf16.mxu0 %v3170_v51  ;;  %v3171_v52 = vld [vmem:[#allocation11 + $0x40] sm:$0xff]  }
 0x2f1   :  { %v761_v42 = vadd.f32 %v736_v7, %v3816_v47  ;;  %2788 = vmatprep.subr.bf16.mxu1 %v3171_v52  ;;  %v3174_v47 = vld [vmem:[#allocation11 + $0x58] sm:$0xff]  }
 0x2f2   :  { %v771_v16 = vpack.c.bf16 %v763_v12, %v762_v10  ;;  %2789 = vmatpush3.bf16.msra.mxu1 %v3171_v52 }
 0x2f3   :  { %v770_v34 = vpack.c.bf16 %v761_v42, %v760_v41  ;;  %2771 = vmatpush3.bf16.msra.mxu0 %v3170_v51  ;;  %2790 = vmatprep.subr.bf16.mxu1 %v3172_v25 }
 0x2f5   :  { %2752 = vmatprep.mubr.bf16.mxu1 %v770_v34 }
 0x2f6   :  { %2753 = vmatmul.mubr.bf16.gmra.mrb[28].mxu1 %v771_v16 }
 0x2f7   :  { %2804 = vmatprep.mubr.bf16.mxu1 %v3761_v6  ;;  %2791 = vmatpush3.bf16.msra.mxu1 %v3172_v25  ;;  %v3175_v6 = vld [vmem:[#allocation11 + $0x60] sm:$0xff]  }
 0x2f8   :  { %2792 = vmatprep.subr.bf16.mxu1 %v3173_v46 }
 0x2fb   :  { %2793 = vmatpush3.bf16.msra.mxu1 %v3173_v46 }
 0x2fc   :  { %2794 = vmatprep.subr.bf16.mxu1 %v3174_v47 }
 0x2ff   :  { %2795 = vmatpush3.bf16.msra.mxu1 %v3174_v47 }
 0x300   :  { %2796 = vmatprep.subr.bf16.mxu1 %v3175_v6 }
 0x303   :  { %2797 = vmatpush3.bf16.msra.mxu1 %v3175_v6 }
 0x304   :  { %2798 = vmatprep.subr.bf16.mxu1 %v3176_v26 }
 0x307   :  { %2799 = vmatpush3.bf16.msra.mxu1 %v3176_v26 }
 0x3b1   :  { %v2742_v18 = vpop.f32.mrb[16].mxu1 }
 0x3b2   :  { %v883_v40 = vadd.f32 %v2742_v18, %v3914_v38  ;;  %v874_v43 = vpop.f32.mrb[17].mxu1 }
 0x3b3   :  { %v875_v14 = vadd.f32 %v874_v43, %v3914_v38  ;;  %v2743_v48 = vpop.f32.mrb[18].mxu1 }
 0x3b4   :  { %v943_v49 = vmul.f32 %v3920_v17, %v883_v40  ;;  %v886_v50 = vadd.f32 %v2743_v48, %v3914_v38  ;;  %v877_v53 = vpop.f32.mrb[19].mxu1 }
 0x3b5   :  { %v941_v29 = vmul.f32 %v3920_v17, %v875_v14  ;;  %v878_v30 = vadd.f32 %v877_v53, %v3914_v38 }
 0x3b6   :  { %v963_v56 = vadd.f32 %v3926_v11, %v943_v49  ;;  %v944_v22 = vmul.f32 %v3920_v17, %v886_v50 }
 0x3b7   :  { %v961_v8 = vadd.f32 %v3926_v11, %v941_v29  ;;  %v942_v23 = vmul.f32 %v3920_v17, %v878_v30 }
 0x3b8   :  { %v964_v9 = vadd.f32 %v3926_v11, %v944_v22  ;;  %v979_v7 = vmax.f32 %v963_v56, 0.0 }
 0x3b9   :  { %v962_v10 = vadd.f32 %v3926_v11, %v942_v23  ;;  %v2746_v12 = vpop.f32.mrb[20].mxu1  ;;  %v977_v34 = vmax.f32 %v961_v8, 0.0 }
 0x3ba   :  { %v980_v41 = vmax.f32 %v964_v9, 0.0  ;;  %v899_v42 = vadd.f32 %v2746_v12, %v3914_v38  ;;  %v890_v16 = vpop.f32.mrb[21].mxu1 }
 0x3bb   :  { %v978_v35 = vmax.f32 %v962_v10, 0.0  ;;  %v891_v5 = vadd.f32 %v890_v16, %v3914_v38  ;;  %v2747_v51 = vpop.f32.mrb[22].mxu1 }
 0x3bc   :  { %v994_v52 = vpack.c.bf16 %v980_v41, %v979_v7  ;;  %v947_v25 = vmul.f32 %v3920_v17, %v899_v42  ;;  %v902_v46 = vadd.f32 %v2747_v51, %v3914_v38  ;;  %v893_v47 = vpop.f32.mrb[23].mxu1 }
 0x3bd   :  { %v945_v6 = vmul.f32 %v3920_v17, %v891_v5  ;;  %v894_v26 = vadd.f32 %v893_v47, %v3914_v38  ;;  %v993_v18 = vpack.c.bf16 %v978_v35, %v977_v34 }
 0x3be   :  { %v967_v40 = vadd.f32 %v3926_v11, %v947_v25  ;;  %v948_v43 = vmul.f32 %v3920_v17, %v902_v46 }
 0x3bf   :  { %v965_v14 = vadd.f32 %v3926_v11, %v945_v6  ;;  %v946_v48 = vmul.f32 %v3920_v17, %v894_v26  ;;  %2772 = vmatprep.mubr.bf16.mxu0 %v993_v18 }
 0x3c0   :  { %v968_v49 = vadd.f32 %v3926_v11, %v948_v43  ;;  %2773 = vmatmul.mubr.bf16.vlgmr.msra.gmra.mrb[16].mxu0 %v994_v52  ;;  %v983_v29 = vmax.f32 %v967_v40, 0.0 }
 0x3c1   :  { %v966_v50 = vadd.f32 %v3926_v11, %v946_v48  ;;  %v2750_v53 = vpop.f32.mrb[24].mxu1  ;;  %v981_v8 = vmax.f32 %v965_v14, 0.0 }
 0x3c2   :  { %v984_v30 = vmax.f32 %v968_v49, 0.0  ;;  %v915_v56 = vadd.f32 %v2750_v53, %v3914_v38  ;;  %v906_v22 = vpop.f32.mrb[25].mxu1 }
 0x3c3   :  { %v982_v23 = vmax.f32 %v966_v50, 0.0  ;;  %v907_v9 = vadd.f32 %v906_v22, %v3914_v38  ;;  %v2751_v10 = vpop.f32.mrb[26].mxu1 }
 0x3c4   :  { %v951_v12 = vmul.f32 %v3920_v17, %v915_v56  ;;  %v918_v7 = vadd.f32 %v2751_v10, %v3914_v38  ;;  %v909_v41 = vpop.f32.mrb[27].mxu1  ;;  %v996_v42 = vpack.c.bf16 %v984_v30, %v983_v29 }
 0x3c5   :  { %v949_v16 = vmul.f32 %v3920_v17, %v907_v9  ;;  %v910_v34 = vadd.f32 %v909_v41, %v3914_v38  ;;  %v995_v35 = vpack.c.bf16 %v982_v23, %v981_v8 }
 0x3c6   :  { %v971_v5 = vadd.f32 %v3926_v11, %v951_v12  ;;  %v952_v51 = vmul.f32 %v3920_v17, %v918_v7 }
 0x3c7   :  { %v969_v52 = vadd.f32 %v3926_v11, %v949_v16  ;;  %v950_v25 = vmul.f32 %v3920_v17, %v910_v34  ;;  %2776 = vmatprep.mubr.bf16.mxu0 %v995_v35 }
 0x3c8   :  { %v972_v46 = vadd.f32 %v3926_v11, %v952_v51  ;;  %2777 = vmatmul.mubr.bf16.gmra.mrb[20].mxu0 %v996_v42  ;;  %v987_v26 = vmax.f32 %v971_v5, 0.0 }
 0x3c9   :  { %v970_v47 = vadd.f32 %v3926_v11, %v950_v25  ;;  %v2754_v6 = vpop.f32.mrb[28].mxu1  ;;  %v985_v14 = vmax.f32 %v969_v52, 0.0  ;;  %v3177_v52 = vld [vmem:[#allocation11 + $0x70] sm:$0xff]  }
 0x3ca   :  { %v988_v18 = vmax.f32 %v972_v46, 0.0  ;;  %v931_v40 = vadd.f32 %v2754_v6, %v3914_v38  ;;  %v922_v43 = vpop.f32.mrb[29].mxu1  ;;  %2800 = vmatprep.subr.bf16.mxu1 %v3177_v52 }
 0x3cb   :  { %v986_v48 = vmax.f32 %v970_v47, 0.0  ;;  %v923_v49 = vadd.f32 %v922_v43, %v3914_v38  ;;  %v2755_v50 = vpop.f32.mrb[30].mxu1  ;;  %2801 = vmatpush3.bf16.msra.mxu1 %v3177_v52 }
 0x3cc   :  { %v955_v53 = vmul.f32 %v3920_v17, %v931_v40  ;;  %v934_v29 = vadd.f32 %v2755_v50, %v3914_v38  ;;  %v925_v30 = vpop.f32.mrb[31].mxu1  ;;  %v998_v56 = vpack.c.bf16 %v988_v18, %v987_v26 }
 0x3cd   :  { %v953_v22 = vmul.f32 %v3920_v17, %v923_v49  ;;  %v926_v8 = vadd.f32 %v925_v30, %v3914_v38  ;;  %v997_v23 = vpack.c.bf16 %v986_v48, %v985_v14 }
 0x3ce   :  { %v975_v9 = vadd.f32 %v3926_v11, %v955_v53  ;;  %v956_v10 = vmul.f32 %v3920_v17, %v934_v29 }
 0x3cf   :  { %v973_v12 = vadd.f32 %v3926_v11, %v953_v22  ;;  %v954_v7 = vmul.f32 %v3920_v17, %v926_v8  ;;  %2780 = vmatprep.mubr.bf16.mxu0 %v997_v23  ;;  %v3178_v17 = vld [vmem:[#allocation11 + $0x78] sm:$0xff]  }
 0x3d0   :  { %v976_v41 = vadd.f32 %v3926_v11, %v956_v10  ;;  %2781 = vmatmul.mubr.bf16.gmra.mrb[24].mxu0 %v998_v56  ;;  %v991_v16 = vmax.f32 %v975_v9, 0.0  ;;  %2802 = vmatprep.subr.bf16.mxu1 %v3178_v17 }
 0x3d1   :  { %v974_v42 = vadd.f32 %v3926_v11, %v954_v7  ;;  %v989_v35 = vmax.f32 %v973_v12, 0.0  ;;  %2803 = vmatpush3.bf16.msra.mxu1 %v3178_v17 }
 0x3d2   :  { %v992_v34 = vmax.f32 %v976_v41, 0.0 }
 0x3d3   :  { %v990_v5 = vmax.f32 %v974_v42, 0.0 }
 0x3d4   :  { %v1000_v38 = vpack.c.bf16 %v992_v34, %v991_v16  ;;  %2805 = vmatmul.mubr.bf16.vlgmr.msra.gmra.mrb[32].mxu1 %v3774_v20 }
 0x3d5   :  { %v999_v51 = vpack.c.bf16 %v990_v5, %v989_v35  ;;  %2808 = vmatprep.mubr.bf16.mxu1 %v3776_v21 }
 0x3d7   :  { %2784 = vmatprep.mubr.bf16.mxu0 %v999_v51 }
 0x3d8   :  { %2785 = vmatmul.mubr.bf16.gmra.mrb[28].mxu0 %v1000_v38 }
 0x3d9   :  { %2868 = vmatprep.mubr.bf16.mxu0 %v3857_v0  ;;  %v4254_v0 = vsub.s32 4, %v3861_v2 }
 0x3db   :  { %v1020_v20 = vrot.slane %v3866_v4, %v4254_v0 }
 0x3dc   :  { %2809 = vmatmul.mubr.bf16.gmra.mrb[36].mxu1 %v3792_v32 }
 0x3dd   :  { %2812 = vmatprep.mubr.bf16.mxu1 %v3794_v33 }
 0x3e4   :  { %2813 = vmatmul.mubr.bf16.gmra.mrb[40].mxu1 %v3810_v44 }
 0x3e5   :  { %2816 = vmatprep.mubr.bf16.mxu1 %v3812_v45 }
 0x3ec   :  { %2817 = vmatmul.mubr.bf16.gmra.mrb[44].mxu1 %v3830_v55 }
 0x3ed   :  { %2836 = vmatprep.mubr.bf16.mxu1 %v3828_v54 }
 0x493   :  { %v2774_v11 = vpop.f32.mrb[16].mxu0 }
 0x494   :  { %v1103_v21 = vpop.f32.mrb[17].mxu0  ;;  %v3992_v46 = vadd.f32 %v2774_v11, %v1020_v20 }
 0x495   :  { %v3988_v25 = vadd.f32 %v1103_v21, %v1020_v20  ;;  %v2775_v32 = vpop.f32.mrb[18].mxu0 }
 0x496   :  { %v3990_v33 = vadd.f32 %v2775_v32, %v1020_v20  ;;  %v1106_v44 = vpop.f32.mrb[19].mxu0  ;;  %v1168_v4 = vmax.f32 %v3992_v46, 0.0 }
 0x497   :  { %v3994_v45 = vadd.f32 %v1106_v44, %v1020_v20  ;;  %v1166_v54 = vmax.f32 %v3988_v25, 0.0 }
 0x498   :  { %v1169_v55 = vmax.f32 %v3990_v33, 0.0 }
 0x499   :  { %v1167_v47 = vmax.f32 %v3994_v45, 0.0 }
 0x49a   :  { %v1351_v40 = vpack.c.bf16 %v1169_v55, %v1168_v4 }
 0x49b   :  { %v1350_v6 = vpack.c.bf16 %v1167_v47, %v1166_v54  ;;  %v2778_v26 = vpop.f32.mrb[20].mxu0 }
 0x49c   :  { %v1119_v18 = vpop.f32.mrb[21].mxu0  ;;  %v4012_v50 = vadd.f32 %v2778_v26, %v1020_v20 }
 0x49d   :  { %v4008_v43 = vadd.f32 %v1119_v18, %v1020_v20  ;;  %v2779_v14 = vpop.f32.mrb[22].mxu0  ;;  %2820 = vmatprep.subr.bf16.mxu1 %v1350_v6 }
 0x49e   :  { %v4010_v48 = vadd.f32 %v2779_v14, %v1020_v20  ;;  %v1122_v49 = vpop.f32.mrb[23].mxu0  ;;  %2821 = vmatpush3.bf16.msra.mxu1 %v1350_v6  ;;  %v1172_v22 = vmax.f32 %v4012_v50, 0.0 }
 0x49f   :  { %v4014_v53 = vadd.f32 %v1122_v49, %v1020_v20  ;;  %2822 = vmatprep.subr.bf16.mxu1 %v1351_v40  ;;  %v1170_v29 = vmax.f32 %v4008_v43, 0.0 }
 0x4a0   :  { %v1173_v30 = vmax.f32 %v4010_v48, 0.0 }
 0x4a1   :  { %v1171_v56 = vmax.f32 %v4014_v53, 0.0 }
 0x4a2   :  { %2823 = vmatpush3.bf16.msra.mxu1 %v1351_v40  ;;  %v1353_v10 = vpack.c.bf16 %v1173_v30, %v1172_v22 }
 0x4a3   :  { %v1352_v8 = vpack.c.bf16 %v1171_v56, %v1170_v29  ;;  %v2782_v23 = vpop.f32.mrb[24].mxu0 }
 0x4a4   :  { %v1135_v9 = vpop.f32.mrb[25].mxu0  ;;  %v4032_v16 = vadd.f32 %v2782_v23, %v1020_v20 }
 0x4a5   :  { %v4028_v12 = vadd.f32 %v1135_v9, %v1020_v20  ;;  %v2783_v7 = vpop.f32.mrb[26].mxu0  ;;  %2824 = vmatprep.subr.bf16.mxu1 %v1352_v8 }
 0x4a6   :  { %v4030_v41 = vadd.f32 %v2783_v7, %v1020_v20  ;;  %v1138_v42 = vpop.f32.mrb[27].mxu0  ;;  %2825 = vmatpush3.bf16.msra.mxu1 %v1352_v8  ;;  %v1176_v51 = vmax.f32 %v4032_v16, 0.0 }
 0x4a7   :  { %v4034_v34 = vadd.f32 %v1138_v42, %v1020_v20  ;;  %2826 = vmatprep.subr.bf16.mxu1 %v1353_v10  ;;  %v1174_v35 = vmax.f32 %v4028_v12, 0.0 }
 0x4a8   :  { %v1177_v5 = vmax.f32 %v4030_v41, 0.0 }
 0x4a9   :  { %v1175_v38 = vmax.f32 %v4034_v34, 0.0 }
 0x4aa   :  { %2827 = vmatpush3.bf16.msra.mxu1 %v1353_v10  ;;  %v1355_v21 = vpack.c.bf16 %v1177_v5, %v1176_v51  ;;  %v4075_v10 = vld [vmem:[#allocation16 + $0x8] sm:$0xff] }
 0x4ab   :  { %v1354_v52 = vpack.c.bf16 %v1175_v38, %v1174_v35  ;;  %v2786_v17 = vpop.f32.mrb[28].mxu0  ;;  %v1204_v7 = vrot.slane %v4075_v10, %v3864_v3 }
 0x4ac   :  { %v1151_v11 = vpop.f32.mrb[29].mxu0  ;;  %v4052_v18 = vadd.f32 %v2786_v17, %v1020_v20 }
 0x4ad   :  { %v4048_v32 = vadd.f32 %v1151_v11, %v1020_v20  ;;  %v2787_v44 = vpop.f32.mrb[30].mxu0  ;;  %2828 = vmatprep.subr.bf16.mxu1 %v1354_v52 }
 0x4ae   :  { %v4050_v6 = vadd.f32 %v2787_v44, %v1020_v20  ;;  %v1154_v26 = vpop.f32.mrb[31].mxu0  ;;  %2829 = vmatpush3.bf16.msra.mxu1 %v1354_v52  ;;  %v1180_v23 = vmax.f32 %v4052_v18, 0.0  ;;  %v3194_v18 = vld [vmem:[#allocation14 + $0x78] sm:$0xff]  }
 0x4af   :  { %v4054_v40 = vadd.f32 %v1154_v26, %v1020_v20  ;;  %2830 = vmatprep.subr.bf16.mxu1 %v1355_v21  ;;  %v1178_v14 = vmax.f32 %v4048_v32, 0.0  ;;  %v4120_v32 = vrot.slane %v4075_v10, %v3909_v36 }
 0x4b0   :  { %v1181_v49 = vmax.f32 %v4050_v6, 0.0  ;;  %v4259_v6 = vsub.s32 2, %v3861_v2 }
 0x4b1   :  { %v4257_v8 = vmax.f32 %v4054_v40, 0.0  ;;  %v4258_v34 = vmax.f32 %v4054_v40, 0.0 }
 0x4b2   :  { %2831 = vmatpush3.bf16.msra.mxu1 %v1355_v21  ;;  %v1357_v20 = vpack.c.bf16 %v1181_v49, %v1180_v23  ;;  %v4125_v40 = vrot.slane %v4075_v10, %v4259_v6 }
 0x4b3   :  { %v1356_v9 = vpack.c.bf16 %v4257_v8, %v1178_v14 }
 0x4b5   :  { %2832 = vmatprep.subr.bf16.mxu1 %v1356_v9 }
 0x4b6   :  { %2833 = vmatpush3.bf16.msra.mxu1 %v1356_v9 }
 0x4b7   :  { %2834 = vmatprep.subr.bf16.mxu1 %v1357_v20 }
 0x4ba   :  { %2835 = vmatpush3.bf16.msra.mxu1 %v1357_v20 }
 0x4bd   :  { %2837 = vmatmul.mubr.bf16.vlgmr.msra.gmra.mrb[32].mxu1 %v3836_v57 }
 0x4be   :  { %2840 = vmatprep.mubr.bf16.mxu1 %v3838_v58 }
 0x4c5   :  { %2841 = vmatmul.mubr.bf16.gmra.mrb[36].mxu1 %v3842_v59 }
 0x4c6   :  { %2844 = vmatprep.mubr.bf16.mxu1 %v3844_v60 }
 0x4cd   :  { %2845 = vmatmul.mubr.bf16.gmra.mrb[40].mxu1 %v3848_v61 }
 0x4ce   :  { %2848 = vmatprep.mubr.bf16.mxu1 %v3850_v62 }
 0x4d5   :  { %2849 = vmatmul.mubr.bf16.gmra.mrb[44].mxu1 %v3854_v63 }
 0x590   :  { %v2838_v42 = vpop.f32.mrb[32].mxu1 }
 0x591   :  { %v3063_v52 = vadd.f32 %v2838_v42, %v1204_v7  ;;  %v1392_v57 = vpop.f32.mrb[33].mxu1 }
 0x592   :  { %v3064_v17 = vadd.f32 %v1392_v57, %v1204_v7  ;;  %v2839_v58 = vpop.f32.mrb[34].mxu1 }
 0x593   :  { %v3065_v11 = vadd.f32 %v2839_v58, %v1204_v7  ;;  %v1395_v59 = vpop.f32.mrb[35].mxu1  ;;  %v1457_v60 = vmax.f32 %v3063_v52, 0.0 }
 0x594   :  { %v3066_v21 = vadd.f32 %v1395_v59, %v1204_v7  ;;  %v1455_v61 = vmax.f32 %v3064_v17, 0.0 }
 0x595   :  { %v1458_v44 = vmax.f32 %v3065_v11, 0.0 }
 0x596   :  { %v1456_v26 = vmax.f32 %v3066_v21, 0.0 }
 0x597   :  { %v1472_v62 = vpack.c.bf16 %v1458_v44, %v1457_v60 }
 0x598   :  { %v1471_v9 = vpack.c.bf16 %v1456_v26, %v1455_v61  ;;  %v2842_v63 = vpop.f32.mrb[36].mxu1 }
 0x599   :  { %v3067_v20 = vadd.f32 %v2842_v63, %v1204_v7  ;;  %v1408_v1 = vpop.f32.mrb[37].mxu1 }
 0x59a   :  { %v3068_v0 = vadd.f32 %v1408_v1, %v1204_v7  ;;  %v2843_v39 = vpop.f32.mrb[38].mxu1  ;;  %2852 = vmatprep.subr.bf16.mxu0 %v1471_v9 }
 0x59b   :  { %v3069_v27 = vadd.f32 %v2843_v39, %v1204_v7  ;;  %v1411_v42 = vpop.f32.mrb[39].mxu1  ;;  %2853 = vmatpush3.bf16.msra.mxu0 %v1471_v9  ;;  %v1461_v58 = vmax.f32 %v3067_v20, 0.0 }
 0x59c   :  { %v3070_v57 = vadd.f32 %v1411_v42, %v1204_v7  ;;  %2854 = vmatprep.subr.bf16.mxu0 %v1472_v62  ;;  %v1459_v59 = vmax.f32 %v3068_v0, 0.0 }
 0x59d   :  { %v1462_v8 = vmax.f32 %v3069_v27, 0.0 }
 0x59e   :  { %v1460_v52 = vmax.f32 %v3070_v57, 0.0 }
 0x59f   :  { %v1474_v11 = vpack.c.bf16 %v1462_v8, %v1461_v58  ;;  %2855 = vmatpush3.bf16.msra.mxu0 %v1472_v62 }
 0x5a0   :  { %v1473_v17 = vpack.c.bf16 %v1460_v52, %v1459_v59  ;;  %v2846_v21 = vpop.f32.mrb[40].mxu1 }
 0x5a1   :  { %v3071_v60 = vadd.f32 %v2846_v21, %v1204_v7  ;;  %v1424_v44 = vpop.f32.mrb[41].mxu1 }
 0x5a2   :  { %v3072_v61 = vadd.f32 %v1424_v44, %v1204_v7  ;;  %v2847_v26 = vpop.f32.mrb[42].mxu1  ;;  %2856 = vmatprep.subr.bf16.mxu0 %v1473_v17 }
 0x5a3   :  { %v3073_v1 = vadd.f32 %v2847_v26, %v1204_v7  ;;  %v1427_v63 = vpop.f32.mrb[43].mxu1  ;;  %2857 = vmatpush3.bf16.msra.mxu0 %v1473_v17  ;;  %v1465_v9 = vmax.f32 %v3071_v60, 0.0 }
 0x5a4   :  { %v3074_v39 = vadd.f32 %v1427_v63, %v1204_v7  ;;  %2858 = vmatprep.subr.bf16.mxu0 %v1474_v11  ;;  %v1463_v20 = vmax.f32 %v3072_v61, 0.0 }
 0x5a5   :  { %v1466_v42 = vmax.f32 %v3073_v1, 0.0 }
 0x5a6   :  { %v1464_v27 = vmax.f32 %v3074_v39, 0.0 }
 0x5a7   :  { %v1476_v0 = vpack.c.bf16 %v1466_v42, %v1465_v9  ;;  %2859 = vmatpush3.bf16.msra.mxu0 %v1474_v11  ;;  %v3179_v11 = vld [vmem:[#allocation13 + $0x40] sm:$0xff]   ;;  %v3180_v9 = vld [vmem:[#allocation13 + $0x48] sm:$0xff]   ;;  %v3182_v42 = vld [vmem:[#allocation13 + $0x58] sm:$0xff]  }
 0x5a8   :  { %v1475_v8 = vpack.c.bf16 %v1464_v27, %v1463_v20  ;;  %v2850_v62 = vpop.f32.mrb[44].mxu1  ;;  %v3183_v20 = vld [vmem:[#allocation13 + $0x60] sm:$0xff]   ;;  %v3184_v27 = vld [vmem:[#allocation13 + $0x68] sm:$0xff]  }
 0x5a9   :  { %v3075_v57 = vadd.f32 %v2850_v62, %v1204_v7  ;;  %v1440_v58 = vpop.f32.mrb[45].mxu1 }
 0x5aa   :  { %v3076_v59 = vadd.f32 %v1440_v58, %v1204_v7  ;;  %v2851_v52 = vpop.f32.mrb[46].mxu1  ;;  %2860 = vmatprep.subr.bf16.mxu0 %v1475_v8 }
 0x5ab   :  { %v3077_v21 = vadd.f32 %v2851_v52, %v1204_v7  ;;  %v1443_v44 = vpop.f32.mrb[47].mxu1  ;;  %2861 = vmatpush3.bf16.msra.mxu0 %v1475_v8  ;;  %v1469_v17 = vmax.f32 %v3075_v57, 0.0 }
 0x5ac   :  { %v3078_v26 = vadd.f32 %v1443_v44, %v1204_v7  ;;  %2862 = vmatprep.subr.bf16.mxu0 %v1476_v0  ;;  %v1467_v60 = vmax.f32 %v3076_v59, 0.0  ;;  %v3181_v7 = vld [vmem:[#allocation13 + $0x50] sm:$0xff]  }
 0x5ad   :  { %v1470_v63 = vmax.f32 %v3077_v21, 0.0 }
 0x5ae   :  { %v1468_v1 = vmax.f32 %v3078_v26, 0.0 }
 0x5af   :  { %v1478_v61 = vpack.c.bf16 %v1470_v63, %v1469_v17  ;;  %2863 = vmatpush3.bf16.msra.mxu0 %v1476_v0  ;;  %v3189_v0 = vld [vmem:[#allocation14 + $0x50] sm:$0xff]  }
 0x5b0   :  { %v1477_v39 = vpack.c.bf16 %v1468_v1, %v1467_v60 }
 0x5b2   :  { %2864 = vmatprep.subr.bf16.mxu0 %v1477_v39 }
 0x5b3   :  { %2865 = vmatpush3.bf16.msra.mxu0 %v1477_v39 }
 0x5b4   :  { %2866 = vmatprep.subr.bf16.mxu0 %v1478_v61 }
 0x5b7   :  { %2867 = vmatpush3.bf16.msra.mxu0 %v1478_v61 }
 0x5b8   :  { %2884 = vmatprep.subr.bf16.mxu0 %v3179_v11 }
 0x5ba   :  { %2869 = vmatmul.mubr.bf16.vlgmr.msra.gmra.mrb[32].mxu0 %v3870_v13  ;;  %v3185_v13 = vld [vmem:[#allocation13 + $0x70] sm:$0xff]  }
 0x5bb   :  { %2872 = vmatprep.mubr.bf16.mxu0 %v3872_v15  ;;  %2885 = vmatpush3.bf16.msra.mxu0 %v3179_v11  ;;  %v3186_v15 = vld [vmem:[#allocation13 + $0x78] sm:$0xff]  }
 0x5bc   :  { %2886 = vmatprep.subr.bf16.mxu0 %v3180_v9 }
 0x5bf   :  { %2887 = vmatpush3.bf16.msra.mxu0 %v3180_v9  ;;  %v3192_v9 = vld [vmem:[#allocation14 + $0x68] sm:$0xff]  }
 0x5c0   :  { %2888 = vmatprep.subr.bf16.mxu0 %v3181_v7 }
 0x5c2   :  { %2873 = vmatmul.mubr.bf16.gmra.mrb[36].mxu0 %v3876_v19  ;;  %v3187_v19 = vld [vmem:[#allocation14 + $0x40] sm:$0xff]  }
 0x5c3   :  { %2876 = vmatprep.mubr.bf16.mxu0 %v3878_v24  ;;  %2889 = vmatpush3.bf16.msra.mxu0 %v3181_v7  ;;  %v3188_v24 = vld [vmem:[#allocation14 + $0x48] sm:$0xff]   ;;  %v3193_v7 = vld [vmem:[#allocation14 + $0x70] sm:$0xff]  }
 0x5c4   :  { %2890 = vmatprep.subr.bf16.mxu0 %v3182_v42  ;;  %2916 = vmatprep.subr.bf16.mxu1 %v3187_v19 }
 0x5c5   :  { %2917 = vmatpush3.bf16.msra.mxu1 %v3187_v19 }
 0x5c6   :  { %2918 = vmatprep.subr.bf16.mxu1 %v3188_v24 }
 0x5c7   :  { %2891 = vmatpush3.bf16.msra.mxu0 %v3182_v42 }
 0x5c8   :  { %2892 = vmatprep.subr.bf16.mxu0 %v3183_v20 }
 0x5c9   :  { %2919 = vmatpush3.bf16.msra.mxu1 %v3188_v24 }
 0x5ca   :  { %2877 = vmatmul.mubr.bf16.gmra.mrb[40].mxu0 %v3882_v28  ;;  %2920 = vmatprep.subr.bf16.mxu1 %v3189_v0  ;;  %v3190_v28 = vld [vmem:[#allocation14 + $0x58] sm:$0xff]  }
 0x5cb   :  { %2880 = vmatprep.mubr.bf16.mxu0 %v3884_v31  ;;  %2893 = vmatpush3.bf16.msra.mxu0 %v3183_v20  ;;  %v3191_v31 = vld [vmem:[#allocation14 + $0x60] sm:$0xff]  }
 0x5cc   :  { %2894 = vmatprep.subr.bf16.mxu0 %v3184_v27 }
 0x5cd   :  { %2921 = vmatpush3.bf16.msra.mxu1 %v3189_v0 }
 0x5ce   :  { %2922 = vmatprep.subr.bf16.mxu1 %v3190_v28 }
 0x5cf   :  { %2895 = vmatpush3.bf16.msra.mxu0 %v3184_v27 }
 0x5d0   :  { %2896 = vmatprep.subr.bf16.mxu0 %v3185_v13 }
 0x5d1   :  { %2923 = vmatpush3.bf16.msra.mxu1 %v3190_v28 }
 0x5d2   :  { %2881 = vmatmul.mubr.bf16.gmra.mrb[44].mxu0 %v3888_v37  ;;  %2924 = vmatprep.subr.bf16.mxu1 %v3191_v31 }
 0x5d3   :  { %2897 = vmatpush3.bf16.msra.mxu0 %v3185_v13 }
 0x5d4   :  { %2898 = vmatprep.subr.bf16.mxu0 %v3186_v15 }
 0x5d5   :  { %2925 = vmatpush3.bf16.msra.mxu1 %v3191_v31 }
 0x5d6   :  { %2926 = vmatprep.subr.bf16.mxu1 %v3192_v9 }
 0x5d7   :  { %2899 = vmatpush3.bf16.msra.mxu0 %v3186_v15 }
 0x5d9   :  { %2927 = vmatpush3.bf16.msra.mxu1 %v3192_v9 }
 0x5da   :  { %2928 = vmatprep.subr.bf16.mxu1 %v3193_v7 }
 0x5dd   :  { %2929 = vmatpush3.bf16.msra.mxu1 %v3193_v7 }
 0x5de   :  { %2930 = vmatprep.subr.bf16.mxu1 %v3194_v18 }
 0x5e1   :  { %2931 = vmatpush3.bf16.msra.mxu1 %v3194_v18 }
 0x68d   :  { %v2870_v37 = vpop.f32.mrb[32].mxu0 }
 0x68e   :  { %v1513_v8 = vpop.f32.mrb[33].mxu0  ;;  %v1578_v57 = vadd.f32 %v2870_v37, %v1168_v4 }
 0x68f   :  { %v2871_v62 = vpop.f32.mrb[34].mxu0  ;;  %v1576_v52 = vadd.f32 %v1513_v8, %v1166_v54 }
 0x690   :  { %v1579_v58 = vadd.f32 %v2871_v62, %v1169_v55  ;;  %v1516_v59 = vpop.f32.mrb[35].mxu0 }
 0x691   :  { %v1577_v21 = vadd.f32 %v1516_v59, %v1167_v47 }
 0x692   :  { %v1593_v44 = vpack.c.bf16 %v1579_v58, %v1578_v57 }
 0x693   :  { %v1592_v26 = vpack.c.bf16 %v1577_v21, %v1576_v52 }
 0x695   :  { %v2874_v17 = vpop.f32.mrb[36].mxu0  ;;  %2900 = vmatprep.mubr.bf16.mxu0 %v1592_v26 }
 0x696   :  { %v1529_v63 = vpop.f32.mrb[37].mxu0  ;;  %2901 = vmatmul.mubr.bf16.vlgmr.msra.gmra.mrb[48].mxu0 %v1593_v44  ;;  %v1582_v46 = vadd.f32 %v2874_v17, %v1172_v22 }
 0x697   :  { %v2875_v60 = vpop.f32.mrb[38].mxu0  ;;  %v1580_v25 = vadd.f32 %v1529_v63, %v1170_v29 }
 0x698   :  { %v1583_v33 = vadd.f32 %v2875_v60, %v1173_v30  ;;  %v1532_v55 = vpop.f32.mrb[39].mxu0 }
 0x699   :  { %v1581_v45 = vadd.f32 %v1532_v55, %v1171_v56 }
 0x69a   :  { %v1595_v54 = vpack.c.bf16 %v1583_v33, %v1582_v46 }
 0x69b   :  { %v1594_v47 = vpack.c.bf16 %v1581_v45, %v1580_v25 }
 0x69d   :  { %v2878_v4 = vpop.f32.mrb[40].mxu0  ;;  %2904 = vmatprep.mubr.bf16.mxu0 %v1594_v47 }
 0x69e   :  { %v1545_v1 = vpop.f32.mrb[41].mxu0  ;;  %2905 = vmatmul.mubr.bf16.gmra.mrb[52].mxu0 %v1595_v54  ;;  %v1586_v50 = vadd.f32 %v2878_v4, %v1176_v51 }
 0x69f   :  { %v2879_v61 = vpop.f32.mrb[42].mxu0  ;;  %v1584_v43 = vadd.f32 %v1545_v1, %v1174_v35 }
 0x6a0   :  { %v1587_v48 = vadd.f32 %v2879_v61, %v1177_v5  ;;  %v1548_v30 = vpop.f32.mrb[43].mxu0 }
 0x6a1   :  { %v1585_v53 = vadd.f32 %v1548_v30, %v1175_v38 }
 0x6a2   :  { %v1597_v29 = vpack.c.bf16 %v1587_v48, %v1586_v50 }
 0x6a3   :  { %v1596_v56 = vpack.c.bf16 %v1585_v53, %v1584_v43 }
 0x6a5   :  { %v2882_v22 = vpop.f32.mrb[44].mxu0  ;;  %2908 = vmatprep.mubr.bf16.mxu0 %v1596_v56 }
 0x6a6   :  { %v1561_v39 = vpop.f32.mrb[45].mxu0  ;;  %2909 = vmatmul.mubr.bf16.gmra.mrb[56].mxu0 %v1597_v29  ;;  %v1590_v16 = vadd.f32 %v2882_v22, %v1180_v23  ;;  %v4260_v23 = vsub.s32 3, %v3861_v2 }
 0x6a7   :  { %v2883_v11 = vpop.f32.mrb[46].mxu0  ;;  %v1588_v12 = vadd.f32 %v1561_v39, %v1178_v14 }
 0x6a8   :  { %v1591_v41 = vadd.f32 %v2883_v11, %v1181_v49  ;;  %v1564_v5 = vpop.f32.mrb[47].mxu0  ;;  %v4131_v42 = vrot.slane %v4075_v10, %v4260_v23 }
 0x6a9   :  { %v1589_v35 = vadd.f32 %v1564_v5, %v4258_v34 }
 0x6aa   :  { %v1599_v38 = vpack.c.bf16 %v1591_v41, %v1590_v16 }
 0x6ab   :  { %v1598_v51 = vpack.c.bf16 %v1589_v35, %v1588_v12 }
 0x6ad   :  { %2912 = vmatprep.mubr.bf16.mxu0 %v1598_v51 }
 0x6ae   :  { %2913 = vmatmul.mubr.bf16.gmra.mrb[60].mxu0 %v1599_v38 }
 0x769   :  { %v2902_v14 = vpop.f32.mrb[48].mxu0 }
 0x76a   :  { %v1712_v49 = vadd.f32 %v2902_v14, %v4120_v32  ;;  %v1703_v20 = vpop.f32.mrb[49].mxu0 }
 0x76b   :  { %v1704_v27 = vadd.f32 %v1703_v20, %v4120_v32  ;;  %v2903_v13 = vpop.f32.mrb[50].mxu0 }
 0x76c   :  { %v1772_v15 = vmul.f32 %v4125_v40, %v1712_v49  ;;  %v1715_v19 = vadd.f32 %v2903_v13, %v4120_v32  ;;  %v1706_v24 = vpop.f32.mrb[51].mxu0 }
 0x76d   :  { %v1770_v0 = vmul.f32 %v4125_v40, %v1704_v27  ;;  %v1707_v28 = vadd.f32 %v1706_v24, %v4120_v32 }
 0x76e   :  { %v1792_v31 = vadd.f32 %v4131_v42, %v1772_v15  ;;  %v1773_v37 = vmul.f32 %v4125_v40, %v1715_v19 }
 0x76f   :  { %v1790_v8 = vadd.f32 %v4131_v42, %v1770_v0  ;;  %v1771_v62 = vmul.f32 %v4125_v40, %v1707_v28 }
 0x770   :  { %v1793_v57 = vadd.f32 %v4131_v42, %v1773_v37  ;;  %v1808_v52 = vmax.f32 %v1792_v31, 0.0 }
 0x771   :  { %v1791_v58 = vadd.f32 %v4131_v42, %v1771_v62  ;;  %v2906_v59 = vpop.f32.mrb[52].mxu0  ;;  %v1806_v17 = vmax.f32 %v1790_v8, 0.0 }
 0x772   :  { %v1809_v21 = vmax.f32 %v1793_v57, 0.0  ;;  %v1728_v44 = vadd.f32 %v2906_v59, %v4120_v32  ;;  %v1719_v26 = vpop.f32.mrb[53].mxu0 }
 0x773   :  { %v1807_v63 = vmax.f32 %v1791_v58, 0.0  ;;  %v1720_v60 = vadd.f32 %v1719_v26, %v4120_v32  ;;  %v2907_v46 = vpop.f32.mrb[54].mxu0 }
 0x774   :  { %v1823_v33 = vpack.c.bf16 %v1809_v21, %v1808_v52  ;;  %v1776_v55 = vmul.f32 %v4125_v40, %v1728_v44  ;;  %v1731_v25 = vadd.f32 %v2907_v46, %v4120_v32  ;;  %v1722_v45 = vpop.f32.mrb[55].mxu0 }
 0x775   :  { %v1774_v54 = vmul.f32 %v4125_v40, %v1720_v60  ;;  %v1723_v47 = vadd.f32 %v1722_v45, %v4120_v32  ;;  %v1822_v4 = vpack.c.bf16 %v1807_v63, %v1806_v17 }
 0x776   :  { %v1796_v1 = vadd.f32 %v4131_v42, %v1776_v55  ;;  %v1777_v61 = vmul.f32 %v4125_v40, %v1731_v25 }
 0x777   :  { %v1794_v50 = vadd.f32 %v4131_v42, %v1774_v54  ;;  %v1775_v48 = vmul.f32 %v4125_v40, %v1723_v47  ;;  %2932 = vmatprep.mubr.bf16.mxu1 %v1822_v4  ;;  %v3532_v47 = vmov 0.0|0.0   ;;  %v3534_v4 = vmov 0.0  }
 0x778   :  { %v1797_v30 = vadd.f32 %v4131_v42, %v1777_v61  ;;  %2933 = vmatmul.mubr.bf16.vlgmr.msra.gmra.mrb[48].mxu1 %v1823_v33  ;;  %v1812_v29 = vmax.f32 %v1796_v1, 0.0  ;;  %3023 = vmatprep.subr.bf16.mxu0 %v3532_v47  ;;  %v3197_v1 = vld [vmem:[#allocation17 + $0x10] sm:$0xff]   ;;  %v3198_v61 = vld [vmem:[#allocation17 + $0x18] sm:$0xff]  }
 0x779   :  { %v1795_v43 = vadd.f32 %v4131_v42, %v1775_v48  ;;  %v2910_v53 = vpop.f32.mrb[56].mxu0  ;;  %v1810_v11 = vmax.f32 %v1794_v50, 0.0  ;;  %2980 = vmatprep.mubr.msk.f32.mxu0 %vm3533_vm0, %v3534_v4  ;;  %2983 = vmatprep.subr.bf16.mxu1 %v3534_v4  ;;  %v3199_v50 = vld [vmem:[#allocation17 + $0x20] sm:$0xff]   ;;  %v3200_v48 = vld [vmem:[#allocation17 + $0x28] sm:$0xff]  }
 0x77a   :  { %v1813_v56 = vmax.f32 %v1797_v30, 0.0  ;;  %v1744_v22 = vadd.f32 %v2910_v53, %v4120_v32  ;;  %v1735_v39 = vpop.f32.mrb[57].mxu0  ;;  %v3201_v30 = vld [vmem:[#allocation17 + $0x30] sm:$0xff]  }
 0x77b   :  { %v1811_v16 = vmax.f32 %v1795_v43, 0.0  ;;  %v1736_v41 = vadd.f32 %v1735_v39, %v4120_v32  ;;  %v2911_v5 = vpop.f32.mrb[58].mxu0  ;;  %v4261_v43 = vsub.s32 4, %v3861_v2 }
 0x77c   :  { %v1780_v12 = vmul.f32 %v4125_v40, %v1744_v22  ;;  %v1747_v34 = vadd.f32 %v2911_v5, %v4120_v32  ;;  %v1738_v35 = vpop.f32.mrb[59].mxu0  ;;  %v1825_v38 = vpack.c.bf16 %v1813_v56, %v1812_v29 }
 0x77d   :  { %v1778_v51 = vmul.f32 %v4125_v40, %v1736_v41  ;;  %v1739_v9 = vadd.f32 %v1738_v35, %v4120_v32  ;;  %v1824_v7 = vpack.c.bf16 %v1811_v16, %v1810_v11  ;;  %v1850_v53 = vrot.slane %v4075_v10, %v4261_v43  ;;  %v3203_v43 = vld [vmem:[#allocation17 + $0x40] sm:$0xff]  }
 0x77e   :  { %v1800_v18 = vadd.f32 %v4131_v42, %v1780_v12  ;;  %v1781_v6 = vmul.f32 %v4125_v40, %v1747_v34 }
 0x77f   :  { %v1798_v14 = vadd.f32 %v4131_v42, %v1778_v51  ;;  %v1779_v49 = vmul.f32 %v4125_v40, %v1739_v9  ;;  %2936 = vmatprep.mubr.bf16.mxu1 %v1824_v7 }
 0x780   :  { %v1801_v23 = vadd.f32 %v4131_v42, %v1781_v6  ;;  %2937 = vmatmul.mubr.bf16.gmra.mrb[52].mxu1 %v1825_v38  ;;  %v1816_v13 = vmax.f32 %v1800_v18, 0.0 }
 0x781   :  { %v1799_v20 = vadd.f32 %v4131_v42, %v1779_v49  ;;  %v2914_v27 = vpop.f32.mrb[60].mxu0  ;;  %v1814_v0 = vmax.f32 %v1798_v14, 0.0 }
 0x782   :  { %v1817_v15 = vmax.f32 %v1801_v23, 0.0  ;;  %v1760_v19 = vadd.f32 %v2914_v27, %v4120_v32  ;;  %v1751_v24 = vpop.f32.mrb[61].mxu0 }
 0x783   :  { %v1815_v28 = vmax.f32 %v1799_v20, 0.0  ;;  %v1752_v31 = vadd.f32 %v1751_v24, %v4120_v32  ;;  %v2915_v37 = vpop.f32.mrb[62].mxu0 }
 0x784   :  { %v1784_v8 = vmul.f32 %v4125_v40, %v1760_v19  ;;  %v1763_v62 = vadd.f32 %v2915_v37, %v4120_v32  ;;  %v1754_v57 = vpop.f32.mrb[63].mxu0  ;;  %v1827_v58 = vpack.c.bf16 %v1817_v15, %v1816_v13 }
 0x785   :  { %v1782_v59 = vmul.f32 %v4125_v40, %v1752_v31  ;;  %v1755_v52 = vadd.f32 %v1754_v57, %v4120_v32  ;;  %v1826_v21 = vpack.c.bf16 %v1815_v28, %v1814_v0 }
 0x786   :  { %v1804_v44 = vadd.f32 %v4131_v42, %v1784_v8  ;;  %v1785_v26 = vmul.f32 %v4125_v40, %v1763_v62 }
 0x787   :  { %v1802_v17 = vadd.f32 %v4131_v42, %v1782_v59  ;;  %v1783_v63 = vmul.f32 %v4125_v40, %v1755_v52  ;;  %2940 = vmatprep.mubr.bf16.mxu1 %v1826_v21  ;;  %v3195_v40 = vld [vmem:[#allocation17] sm:$0xff]  }
 0x788   :  { %v1805_v60 = vadd.f32 %v4131_v42, %v1785_v26  ;;  %2941 = vmatmul.mubr.bf16.gmra.mrb[56].mxu1 %v1827_v58  ;;  %v1820_v33 = vmax.f32 %v1804_v44, 0.0 }
 0x789   :  { %v1803_v46 = vadd.f32 %v4131_v42, %v1783_v63  ;;  %v1818_v25 = vmax.f32 %v1802_v17, 0.0  ;;  %2984 = vmatpush3.bf16.msra.mxu1 %v3195_v40  ;;  %v3196_v42 = vld [vmem:[#allocation17 + $0x8] sm:$0xff]  }
 0x78a   :  { %v1821_v55 = vmax.f32 %v1805_v60, 0.0  ;;  %2985 = vmatprep.subr.bf16.mxu1 %v3534_v4 }
 0x78b   :  { %v1819_v45 = vmax.f32 %v1803_v46, 0.0 }
 0x78c   :  { %v1829_v32 = vpack.c.bf16 %v1821_v55, %v1820_v33 }
 0x78d   :  { %v1828_v54 = vpack.c.bf16 %v1819_v45, %v1818_v25  ;;  %2986 = vmatpush3.bf16.msra.mxu1 %v3196_v42 }
 0x78e   :  { %2987 = vmatprep.subr.bf16.mxu1 %v3534_v4 }
 0x78f   :  { %2944 = vmatprep.mubr.bf16.mxu1 %v1828_v54 }
 0x790   :  { %2945 = vmatmul.mubr.bf16.gmra.mrb[60].mxu1 %v1829_v32 }
 0x791   :  { %2999 = vmatprep.mubr.msk.bf16.mxu1 %vm3533_vm0, %v3534_v4  ;;  %2988 = vmatpush3.bf16.msra.mxu1 %v3197_v1 }
 0x792   :  { %2989 = vmatprep.subr.bf16.mxu1 %v3534_v4 }
 0x795   :  { %2990 = vmatpush3.bf16.msra.mxu1 %v3198_v61 }
 0x796   :  { %2991 = vmatprep.subr.bf16.mxu1 %v3534_v4 }
 0x799   :  { %2992 = vmatpush3.bf16.msra.mxu1 %v3199_v50 }
 0x79a   :  { %2993 = vmatprep.subr.bf16.mxu1 %v3534_v4 }
 0x79d   :  { %2994 = vmatpush3.bf16.msra.mxu1 %v3200_v48  ;;  %v2012_v48 = vld [vmem:[#allocation10] sm:$0xff] }
 0x79e   :  { %2995 = vmatprep.subr.bf16.mxu1 %v3534_v4 }
 0x7a1   :  { %2996 = vmatpush3.bf16.msra.mxu1 %v3201_v30  ;;  %v3202_v30 = vld [vmem:[#allocation17 + $0x38] sm:$0xff]  }
 0x7a2   :  { %2997 = vmatprep.subr.bf16.mxu1 %v3534_v4 }
 0x7a5   :  { %2998 = vmatpush3.bf16.msra.mxu1 %v3202_v30 }
 0x84b   :  { %v2934_v29 = vpop.f32.mrb[48].mxu1 }
 0x84c   :  { %v1942_v56 = vadd.f32 %v2934_v29, %v1850_v53  ;;  %v1933_v22 = vpop.f32.mrb[49].mxu1  ;;  %v3205_v29 = vld [vmem:[#allocation17 + $0x50] sm:$0xff]  }
 0x84d   :  { %v1934_v39 = vadd.f32 %v1933_v22, %v1850_v53  ;;  %v2935_v11 = vpop.f32.mrb[50].mxu1  ;;  %v3208_v22 = vld [vmem:[#allocation17 + $0x68] sm:$0xff]  }
 0x84e   :  { %v1945_v16 = vadd.f32 %v2935_v11, %v1850_v53  ;;  %v1936_v41 = vpop.f32.mrb[51].mxu1  ;;  %v1998_v12 = vmax.f32 %v1942_v56, 0.0  ;;  %v3207_v56 = vld [vmem:[#allocation17 + $0x60] sm:$0xff]  }
 0x84f   :  { %v1937_v5 = vadd.f32 %v1936_v41, %v1850_v53  ;;  %v1996_v35 = vmax.f32 %v1934_v39, 0.0  ;;  %v3209_v41 = vld [vmem:[#allocation17 + $0x70] sm:$0xff]  }
 0x850   :  { %v1999_v34 = vmax.f32 %v1945_v16, 0.0 }
 0x851   :  { %v1997_v38 = vmax.f32 %v1937_v5, 0.0  ;;  %v3210_v5 = vld [vmem:[#allocation17 + $0x78] sm:$0xff]  }
 0x852   :  { %v3027_v51 = vpack.c.bf16 %v1999_v34, %v1998_v12  ;;  %v2084_v12 = vld [vmem:[#allocation19] sm:$0xff] }
 0x853   :  { %v3024_v9 = vpack.c.bf16 %v1997_v38, %v1996_v35  ;;  %v2938_v7 = vpop.f32.mrb[52].mxu1  ;;  %v2105_v34 = vrot.slane %v2084_v12, %v3864_v3 }
 0x854   :  { %v1958_v18 = vadd.f32 %v2938_v7, %v1850_v53  ;;  %v1949_v6 = vpop.f32.mrb[53].mxu1 }
 0x855   :  { %v1950_v2 = vadd.f32 %v1949_v6, %v1850_v53  ;;  %v2939_v14 = vpop.f32.mrb[54].mxu1  ;;  %3025 = vmatpush3.bf16.msra.mxu0 %v3024_v9 }
 0x856   :  { %v1961_v10 = vadd.f32 %v2939_v14, %v1850_v53  ;;  %v1952_v49 = vpop.f32.mrb[55].mxu1  ;;  %3026 = vmatprep.subr.bf16.mxu0 %v3532_v47  ;;  %v2002_v20 = vmax.f32 %v1958_v18, 0.0 }
 0x857   :  { %v1953_v23 = vadd.f32 %v1952_v49, %v1850_v53  ;;  %v2000_v13 = vmax.f32 %v1950_v2, 0.0  ;;  %v4262_v2 = vlaneseq }
 0x858   :  { %v2003_v27 = vmax.f32 %v1961_v10, 0.0  ;;  %v2216_v10 = vrot.slane %v2084_v12, %v3909_v36 }
 0x859   :  { %v2001_v15 = vmax.f32 %v1953_v23, 0.0  ;;  %3028 = vmatpush3.bf16.msra.mxu0 %v3027_v51  ;;  %v2306_v14 = vand.u32 127, %v4262_v2 }
 0x85a   :  { %v3033_v19 = vpack.c.bf16 %v2003_v27, %v2002_v20  ;;  %3029 = vmatprep.subr.bf16.mxu0 %v3532_v47 }
 0x85b   :  { %v3030_v24 = vpack.c.bf16 %v2001_v15, %v2000_v13  ;;  %v2942_v0 = vpop.f32.mrb[56].mxu1  ;;  %vm2307_vm1 = vcmp.lt.s32.totalorder %v2306_v14, 2 }
 0x85c   :  { %v1974_v28 = vadd.f32 %v2942_v0, %v1850_v53  ;;  %v1965_v31 = vpop.f32.mrb[57].mxu1 }
 0x85d   :  { %v1966_v37 = vadd.f32 %v1965_v31, %v1850_v53  ;;  %v2943_v8 = vpop.f32.mrb[58].mxu1  ;;  %3031 = vmatpush3.bf16.msra.mxu0 %v3030_v24 }
 0x85e   :  { %v1977_v62 = vadd.f32 %v2943_v8, %v1850_v53  ;;  %v1968_v57 = vpop.f32.mrb[59].mxu1  ;;  %3032 = vmatprep.subr.bf16.mxu0 %v3532_v47  ;;  %v2006_v59 = vmax.f32 %v1974_v28, 0.0 }
 0x85f   :  { %v1969_v58 = vadd.f32 %v1968_v57, %v1850_v53  ;;  %v2004_v21 = vmax.f32 %v1966_v37, 0.0 }
 0x860   :  { %v2007_v52 = vmax.f32 %v1977_v62, 0.0 }
 0x861   :  { %v2005_v44 = vmax.f32 %v1969_v58, 0.0  ;;  %3034 = vmatpush3.bf16.msra.mxu0 %v3033_v19 }
 0x862   :  { %v3039_v26 = vpack.c.bf16 %v2007_v52, %v2006_v59  ;;  %3035 = vmatprep.subr.bf16.mxu0 %v3532_v47 }
 0x863   :  { %v3036_v17 = vpack.c.bf16 %v2005_v44, %v2004_v21  ;;  %v2946_v63 = vpop.f32.mrb[60].mxu1 }
 0x864   :  { %v1990_v60 = vadd.f32 %v2946_v63, %v1850_v53  ;;  %v1981_v46 = vpop.f32.mrb[61].mxu1 }
 0x865   :  { %v1982_v33 = vadd.f32 %v1981_v46, %v1850_v53  ;;  %v2947_v55 = vpop.f32.mrb[62].mxu1  ;;  %3037 = vmatpush3.bf16.msra.mxu0 %v3036_v17 }
 0x866   :  { %v1993_v25 = vadd.f32 %v2947_v55, %v1850_v53  ;;  %v1984_v45 = vpop.f32.mrb[63].mxu1  ;;  %3038 = vmatprep.subr.bf16.mxu0 %v3532_v47  ;;  %v2010_v54 = vmax.f32 %v1990_v60, 0.0 }
 0x867   :  { %v1985_v32 = vadd.f32 %v1984_v45, %v1850_v53  ;;  %v2008_v42 = vmax.f32 %v1982_v33, 0.0  ;;  %v3204_v53 = vld [vmem:[#allocation17 + $0x48] sm:$0xff]  }
 0x868   :  { %v2011_v40 = vmax.f32 %v1993_v25, 0.0 }
 0x869   :  { %v2009_v1 = vmax.f32 %v1985_v32, 0.0  ;;  %3040 = vmatpush3.bf16.msra.mxu0 %v3039_v26 }
 0x86a   :  { %v3045_v61 = vpack.c.bf16 %v2011_v40, %v2010_v54  ;;  %3041 = vmatprep.subr.bf16.mxu0 %v3532_v47 }
 0x86b   :  { %v3042_v50 = vpack.c.bf16 %v2009_v1, %v2008_v42 }
 0x86d   :  { %3043 = vmatpush3.bf16.msra.mxu0 %v3042_v50 }
 0x86e   :  { %3044 = vmatprep.subr.bf16.mxu0 %v3532_v47  ;;  %v3206_v47 = vld [vmem:[#allocation17 + $0x58] sm:$0xff]  }
 0x871   :  { %3046 = vmatpush3.bf16.msra.mxu0 %v3045_v61 }
 0x872   :  { %3003 = vmatprep.subr.bf16.mxu0 %v3534_v4 }
 0x874   :  { %2981 = vmatmul.mubr.f32.vlgmr.msra.gmra.mrb[64].mxu0 %v2012_v48 }
 0x875   :  { %3019 = vmatprep.mubr.msk.bf16.mxu0 %vm3533_vm0, %v3534_v4  ;;  %3004 = vmatpush3.bf16.msra.mxu0 %v3203_v43 }
 0x876   :  { %3005 = vmatprep.subr.bf16.mxu0 %v3534_v4 }
 0x879   :  { %3006 = vmatpush3.bf16.msra.mxu0 %v3204_v53 }
 0x87a   :  { %3007 = vmatprep.subr.bf16.mxu0 %v3534_v4 }
 0x87d   :  { %3008 = vmatpush3.bf16.msra.mxu0 %v3205_v29 }
 0x87e   :  { %3009 = vmatprep.subr.bf16.mxu0 %v3534_v4 }
 0x881   :  { %3010 = vmatpush3.bf16.msra.mxu0 %v3206_v47 }
 0x882   :  { %3011 = vmatprep.subr.bf16.mxu0 %v3534_v4 }
 0x885   :  { %3012 = vmatpush3.bf16.msra.mxu0 %v3207_v56 }
 0x886   :  { %3013 = vmatprep.subr.bf16.mxu0 %v3534_v4 }
 0x889   :  { %3014 = vmatpush3.bf16.msra.mxu0 %v3208_v22 }
 0x88a   :  { %3015 = vmatprep.subr.bf16.mxu0 %v3534_v4 }
 0x88d   :  { %3016 = vmatpush3.bf16.msra.mxu0 %v3209_v41 }
 0x88e   :  { %3017 = vmatprep.subr.bf16.mxu0 %v3534_v4 }
 0x891   :  { %3018 = vmatpush3.bf16.msra.mxu0 %v3210_v5 }
 0x947   :  { %v2079_v39 = vpop.f32.mrb[64].mxu0 }
 0x948   :  { %v2085_v11 = vpack.c.bf16 %v2079_v39, %v2079_v39  ;;  %2083 = vst [vmem:[#allocation21] sm:$0xff] %v2079_v39  ;;  %v2982_v16 = vpop.f32.mrb[65].mxu0 }
 0x94a   :  { %3000 = vmatmul.mubr.bf16.vlgmr.msra.gmra.mrb[64].mxu1 %v2085_v11 }
 0xa1d   :  { %v2188_v35 = vpop.f32.mrb[64].mxu1 }
 0xa1e   :  { %v2189_v38 = vadd.f32 %v2188_v35, %v2105_v34  ;;  %v3001_v51 = vpop.f32.mrb[65].mxu1 }
 0xa1f   :  { %v2191_v9 = vpop.f32.mrb[66].mxu1 }
 0xa20   :  { %v2194_v7 = vmax.f32 %v2189_v38, 0.0  ;;  %v3002_v18 = vpop.f32.mrb[67].mxu1 }
 0xa22   :  { %v2195_v6 = vpack.c.bf16 %v2194_v7, %v2194_v7 }
 0xa24   :  { %3020 = vmatmul.mubr.bf16.vlgmr.msra.gmra.mrb[68].mxu0 %v2195_v6 }
 0xaf7   :  { %v2299_v49 = vpop.f32.mrb[68].mxu0 }
 0xaf8   :  { %v2300_v4 = vadd.f32 %v2299_v49, %v2216_v10  ;;  %v3021_v23 = vpop.f32.mrb[69].mxu0 }
 0xaf9   :  { %v2302_v20 = vpop.f32.mrb[70].mxu0 }
 0xafa   :  { %v3022_v27 = vpop.f32.mrb[71].mxu0  ;;  %v2308_v13 = vsel %vm2307_vm1, %v2300_v4, -1e+30 }
 0xafb   :  { %2309 = vmax.xlane.f32.xlu0 %v2308_v13 }
 0xb88   :  { %v2310_v3 = vpop.xlane.xlu0 %2309 }
 0xb89   :  { %v2311_v15 = vsub.f32 %v2308_v13, %v2310_v3 }
 0xb8b   :  { %v2312_v19 = vmul.f32 1.442695, %v2311_v15 }
 0xb8d   :  { %3211 = vpow2.f32 %v2312_v19 }
 0xb97   :  { %v3212_v24 = vpop.eup %3211 }
 0xb98   :  { %2314 = vadd.xlane.f32.xlu0 %v3212_v24 }
 0xb99   :  { %3468 = shalt.err (!%p3465_p8)
}
 0xb9a   :  { %s3469_s26 = scalar_lea.hbm %s4252_s12, 128 }
 0xb9b   :  { %p3470_p9 = scmp.ne.s32.totalorder %s4252_s12, %s3469_s26  ;;  %p3473_p10 = scmp.lt.u32.totalorder %s3469_s26, %s4252_s12 }
 0xb9d   :  { %p3475_p11 = pnand %p3473_p10, %p3470_p9 }
 0xb9f   :  { %3478 = shalt.err (!%p3475_p11)
}
 0xba0   :  { %2338 = dma.vmem_to_hbm [thread:$0]  %s2336_s29, 128, %s4252_s12, [#allocation22]  }
 0xba1   :  { %s3536_s16 = smov [#allocation20]  }
 0xba2   :  { %s2325_s2 = sshll.u32 %s3536_s16, 4  ;;  %s2326_s2 = int_to_ptr.vmem [resolvable:$true] %s2325_s2 }
 0xba3   :  { %s3479_s24 = scalar_lea.vmem %s2326_s2, 128  ;;  %p3484_p13 = scmp.lt.s32.totalorder %s2326_s2, %s2326_s2 }
 0xba4   :  { %p3480_p12 = scmp.ne.s32.totalorder %s2326_s2, %s3479_s24  ;;  %p3485_p0 = scmp.lt.s32.totalorder %s3479_s24, %s3479_s24 }
 0xba6   :  { %p3486_p1 = por %p3485_p0, %p3484_p13 }
 0xba8   :  { %p3487_p2 = pnand %p3486_p1, %p3480_p12 }
 0xc25   :  { %v2315_v36 = vpop.xlane.xlu0 %2314 }
 0xc26   :  { %3213 = vrcp.f32 %v2315_v36 }
 0xc30   :  { %v3214_v0 = vpop.eup %3213 }
 0xc31   :  { %v2317_v28 = vmul.f32 %v3214_v0, %v3212_v24 }
 0xc33   :  { %2318 = vst [vmem:[#allocation20] sm:$0xff] %v2317_v28 }
 0xc34   :  { %3490 = shalt.err (!%p3487_p2)
}
 0xc35   :  { %s3491_s13 = scalar_lea.hbm %s4251_s11, 128 }
 0xc36   :  { %p3492_p3 = scmp.ne.s32.totalorder %s4251_s11, %s3491_s13  ;;  %p3495_p4 = scmp.lt.u32.totalorder %s3491_s13, %s4251_s11 }
 0xc38   :  { %p3497_p5 = pnand %p3495_p4, %p3492_p3 }
 0xc3a   :  { %3500 = shalt.err (!%p3497_p5)
}
 0xc3b   :  { %2328 = dma.vmem_to_hbm [thread:$0]  %s2326_s2, 128, %s4251_s11, [#allocation4]  }
 0xc3c   :  { %3513 = dma.done.wait [#allocation4], 128  }
 0xc3d   :  { %3514 = vsyncadd [#allocation4], 4294967168 }
 0xc3e   :  { %3515 = dma.done.wait [#allocation22], 128  }
 0xc3f   :  { %3516 = vsyncadd [#allocation22], 4294967168 }
 0xc40   :  { %2345 = vsyncpa [#allocation3], 1 }
 0xc41   :  { %2346 = vsyncpa [#allocation6], 1 }
 0xc42   :  { %2347 = vsyncpa [#allocation9], 1 }
 0xc43   :  { %2348 = vsyncpa [#allocation12], 1 }
 0xc44   :  { %2349 = vsyncpa [#allocation15], 1 }
 0xc45   :  { %2350 = vsyncpa [#allocation18], 1 }
 0xc46   :  { %2351 = vsyncpa [#allocation4], 1 }
 0xc47   :  { %2352 = vsyncpa [#allocation22], 1 }

</bundles_post_ra>
